<compile_context>
chip_gen: v5e
topology: v5e:2x2
jax: 0.10.0
libtpu: 0.0.40
codegen_flags: <defaults>
</compile_context>

<pallas_src>
import functools

import jax
import jax.numpy as jnp
from jax.experimental import pallas as pl
from jax.experimental.pallas import tpu as pltpu


def _fused_cnn_kernel(p0_ref, w0_ref, b0_ref, w1_ref, b1_ref, g_ref, bt_ref,
                      out_ref, pp_ref, *, N, H, W, Cin, C1, C2, eps):
    Ho, Wo = H // 2, W // 2
    M2 = N * Ho * Wo                       # conv1 / pooled rows (n*Ho*Wo + ho*Wo + wo)

    # ---- conv0 (3x3, pad 1): ONE MXU dot on the wrapper-built im2col patches ----
    # p0 rows are ordered (hp, wp, n, ho, wo) with h = 2*ho+hp, w = 2*wo+wp.
    acc0 = jnp.dot(p0_ref[...], w0_ref[...], preferred_element_type=jnp.float32)
    y0 = jnp.maximum(acc0 + b0_ref[...], 0.0)                    # (4*M2, C1)

    # ---- maxpool 2x2 / stride 2: elementwise max of the 4 quadrant row-blocks ----
    pooled = jnp.maximum(
        jnp.maximum(y0[0 * M2:1 * M2], y0[1 * M2:2 * M2]),
        jnp.maximum(y0[2 * M2:3 * M2], y0[3 * M2:4 * M2]))       # (M2, C1), rows (n,ho,wo)

    # ---- zero-pad the pooled activation (VMEM scratch) for conv1's 'same' padding ----
    pp_ref[...] = jnp.zeros(pp_ref.shape, pp_ref.dtype)
    pp_ref[:, 1:Ho + 1, 1:Wo + 1, :] = pooled.reshape(N, Ho, Wo, C1)

    # ---- conv1 (3x3, pad 1): concat the 9 shifted slices along K -> ONE MXU dot ----
    taps = [pp_ref[:, dy:dy + Ho, dx:dx + Wo, :].reshape(M2, C1)
            for dy in range(3) for dx in range(3)]
    patches1 = jnp.concatenate(taps, axis=-1)                    # (M2, 9*C1)
    acc1 = jnp.dot(patches1, w1_ref[...],
                   preferred_element_type=jnp.float32)           # (M2, C2)

    # ---- channel-major (lane-dense) layout for bias + BatchNorm + ReLU + store ----
    y1 = jnp.transpose(acc1) + b1_ref[...]                       # (C2, M2)

    # one-pass training-mode batch stats (biased variance): var = E[x^2] - mean^2
    inv_m = 1.0 / M2
    mean = jnp.sum(y1, axis=1, keepdims=True) * inv_m            # (C2, 1)
    ex2 = jnp.sum(y1 * y1, axis=1, keepdims=True) * inv_m        # (C2, 1)
    var = jnp.maximum(ex2 - mean * mean, 0.0)
    scale = g_ref[...] * jax.lax.rsqrt(var + eps)
    shift = bt_ref[...] - mean * scale
    out_ref[...] = jnp.maximum(y1 * scale + shift, 0.0)          # (C2, M2) lane-dense


def cnn_forward(x_nchw, params, *, eps=1e-5):
    """Forward pass matching the PyTorch CNN config above. x_nchw: (N, Cin, H, W) f32."""
    N, Cin, H, W = x_nchw.shape
    kh, kw, w_cin, C1 = params["w0"].shape
    C2 = params["w1"].shape[-1]
    assert (kh, kw) == (3, 3) and w_cin == Cin, "kernel expects 3x3 convs"
    assert H % 2 == 0 and W % 2 == 0, "2x2 maxpool needs even spatial dims"
    Ho, Wo = H // 2, W // 2
    M2 = N * Ho * Wo

    # conv0 im2col in XLA (~73 KiB): NCHW -> NHWC, 'same' zero pad, 9 shifted slices
    # concatenated along K, rows re-ordered (hp, wp, n, ho, wo) so the in-kernel 2x2
    # maxpool is an elementwise max of 4 contiguous row blocks.
    x_nhwc = jnp.transpose(x_nchw, (0, 2, 3, 1)).astype(jnp.float32)
    xp = jnp.pad(x_nhwc, ((0, 0), (1, 1), (1, 1), (0, 0)))
    taps = [xp[:, dy:dy + H, dx:dx + W, :] for dy in range(3) for dx in range(3)]
    patches0 = jnp.concatenate(taps, axis=-1)                    # (N, H, W, 9*Cin)
    patches0 = patches0.reshape(N, Ho, 2, Wo, 2, 9 * Cin)
    patches0 = jnp.transpose(patches0, (2, 4, 0, 1, 3, 5)).reshape(4 * M2, 9 * Cin)

    kernel = functools.partial(_fused_cnn_kernel, N=N, H=H, W=W,
                               Cin=Cin, C1=C1, C2=C2, eps=eps)

    out_cm = pl.pallas_call(
        kernel,
        out_shape=jax.ShapeDtypeStruct((C2, M2), jnp.float32),
        scratch_shapes=[
            pltpu.VMEM((N, Ho + 2, Wo + 2, C1), jnp.float32),    # zero-padded pooled act.
        ],
    )(patches0,
      params["w0"].reshape(9 * Cin, C1),     # K order (dy*3+dx, cin) -> matches patches
      params["b0"].reshape(1, C1),
      params["w1"].reshape(9 * C1, C2),      # K order (dy*3+dx, c1)  -> matches taps
      params["b1"].reshape(C2, 1),
      params["gamma"].reshape(C2, 1),
      params["beta"].reshape(C2, 1))

    # (C2, N*HW) -> NCHW flatten order: tiny (~8 KiB) reorder in XLA.
    out = jnp.transpose(out_cm.reshape(C2, N, Ho * Wo), (1, 0, 2))
    return out.reshape(N, C2 * Ho * Wo)


def _reference_forward(x, params, eps=1e-5):
    """Pure-JAX/XLA reference of the same forward pass (for correctness check)."""
    w0 = jnp.transpose(params["w0"], (3, 2, 0, 1))   # HWIO -> OIHW
    w1 = jnp.transpose(params["w1"], (3, 2, 0, 1))
    dn = ("NCHW", "OIHW", "NCHW")
    y = jax.lax.conv_general_dilated(x, w0, (1, 1), ((1, 1), (1, 1)),
                                     dimension_numbers=dn)
    y = y + params["b0"][None, :, None, None]
    y = jnp.maximum(y, 0.0)
    y = jax.lax.reduce_window(y, -jnp.inf, jax.lax.max,
                              (1, 1, 2, 2), (1, 1, 2, 2), "VALID")
    y = jax.lax.conv_general_dilated(y, w1, (1, 1), ((1, 1), (1, 1)),
                                     dimension_numbers=dn)
    y = y + params["b1"][None, :, None, None]
    mean = jnp.mean(y, axis=(0, 2, 3), keepdims=True)
    var = jnp.mean((y - mean) ** 2, axis=(0, 2, 3), keepdims=True)
    y = (y - mean) / jnp.sqrt(var + eps)
    y = y * params["gamma"][None, :, None, None] + params["beta"][None, :, None, None]
    y = jnp.maximum(y, 0.0)
    return y.reshape(y.shape[0], -1)


if __name__ == "__main__":
    key = jax.random.PRNGKey(0)
    N, Cin, H, W = 2, 4, 16, 16
    C1, C2, k = 8, 16, 3

    keys = jax.random.split(key, 5)
    x = jax.random.normal(keys[0], (N, Cin, H, W), jnp.float32)

    # Deterministic init mirroring PyTorch Conv2d defaults (uniform +/- 1/sqrt(fan_in)).
    bound0 = 1.0 / (Cin * k * k) ** 0.5
    w0 = jax.random.uniform(keys[1], (k, k, Cin, C1), jnp.float32, -bound0, bound0)
    b0 = jax.random.uniform(keys[2], (C1,), jnp.float32, -bound0, bound0)
    bound1 = 1.0 / (C1 * k * k) ** 0.5
    w1 = jax.random.uniform(keys[3], (k, k, C1, C2), jnp.float32, -bound1, bound1)
    b1 = jax.random.uniform(keys[4], (C2,), jnp.float32, -bound1, bound1)
    gamma = jnp.ones((C2,), jnp.float32)   # BatchNorm2d default affine init
    beta = jnp.zeros((C2,), jnp.float32)

    params = dict(w0=w0, b0=b0, w1=w1, b1=b1, gamma=gamma, beta=beta)

    out = jax.jit(cnn_forward)(x, params)
    jax.block_until_ready(out)
    assert out.shape == (N, C2 * (H // 2) * (W // 2)), out.shape
    assert bool(jnp.all(jnp.isfinite(out)))

    ref = _reference_forward(x, params)
    max_err = float(jnp.max(jnp.abs(out - ref)))
    assert bool(jnp.allclose(out, ref, atol=2e-3, rtol=2e-3)), max_err

    print("KERNEL_OK")
</pallas_src>

<mosaic_0001>
module attributes {stable_mosaic.version = 11 : i64} {
  func.func @_fused_cnn_kernel(%arg0: memref<512x36xf32, #tpu.memory_space<vmem>>, %arg1: memref<36x8xf32, #tpu.memory_space<vmem>>, %arg2: memref<1x8xf32, #tpu.memory_space<vmem>>, %arg3: memref<72x16xf32, #tpu.memory_space<vmem>>, %arg4: memref<16x1xf32, #tpu.memory_space<vmem>>, %arg5: memref<16x1xf32, #tpu.memory_space<vmem>>, %arg6: memref<16x1xf32, #tpu.memory_space<vmem>>, %arg7: memref<16x128xf32, #tpu.memory_space<vmem>>, %arg8: memref<2x10x10x8xf32, #tpu.memory_space<vmem>>) attributes {dimension_semantics = [], scalar_prefetch = 0 : i64, scratch_operands = 1 : i64, tpu.core_type = #tpu.core_type<tc>} {
    %c0 = arith.constant 0 : index
    %c0_0 = arith.constant 0 : index
    %0 = vector.load %arg0[%c0, %c0_0] : memref<512x36xf32, #tpu.memory_space<vmem>>, vector<512x36xf32>
    %c0_1 = arith.constant 0 : index
    %c0_2 = arith.constant 0 : index
    %1 = vector.load %arg1[%c0_1, %c0_2] : memref<36x8xf32, #tpu.memory_space<vmem>>, vector<36x8xf32>
    %cst = arith.constant dense<0.000000e+00> : vector<512x8xf32>
    %2 = tpu.matmul %0, %1, %cst {dimension_numbers = #tpu.dot_dimension_numbers<[1], [0], [0], [1], [0, 0, 1, 1], [], []>} : vector<512x36xf32>, vector<36x8xf32>, vector<512x8xf32> -> vector<512x8xf32>
    %c0_3 = arith.constant 0 : index
    %c0_4 = arith.constant 0 : index
    %3 = vector.load %arg2[%c0_3, %c0_4] : memref<1x8xf32, #tpu.memory_space<vmem>>, vector<1x8xf32>
    %4 = vector.broadcast %3 : vector<1x8xf32> to vector<512x8xf32>
    %5 = arith.addf %2, %4 : vector<512x8xf32>
    %cst_5 = arith.constant 0.000000e+00 : f32
    %6 = vector.broadcast %cst_5 : f32 to vector<512x8xf32>
    %7 = arith.maximumf %5, %6 : vector<512x8xf32>
    %8 = vector.extract_strided_slice %7 {offsets = [0, 0], sizes = [128, 8], strides = [1, 1]} : vector<512x8xf32> to vector<128x8xf32>
    %9 = vector.extract_strided_slice %7 {offsets = [128, 0], sizes = [128, 8], strides = [1, 1]} : vector<512x8xf32> to vector<128x8xf32>
    %10 = arith.maximumf %8, %9 : vector<128x8xf32>
    %11 = vector.extract_strided_slice %7 {offsets = [256, 0], sizes = [128, 8], strides = [1, 1]} : vector<512x8xf32> to vector<128x8xf32>
    %12 = vector.extract_strided_slice %7 {offsets = [384, 0], sizes = [128, 8], strides = [1, 1]} : vector<512x8xf32> to vector<128x8xf32>
    %13 = arith.maximumf %11, %12 : vector<128x8xf32>
    %14 = arith.maximumf %10, %13 : vector<128x8xf32>
    %cst_6 = arith.constant 0.000000e+00 : f32
    %15 = vector.broadcast %cst_6 : f32 to vector<2x10x10x8xf32>
    %c0_7 = arith.constant 0 : index
    %c0_8 = arith.constant 0 : index
    %c0_9 = arith.constant 0 : index
    %c0_10 = arith.constant 0 : index
    %16 = vector.load %arg8[%c0_7, %c0_8, %c0_9, %c0_10] : memref<2x10x10x8xf32, #tpu.memory_space<vmem>>, vector<2x10x10x8xf32>
    tpu.vector_store %arg8[%c0_7, %c0_8, %c0_9, %c0_10], %15 {strides = array<i32>} : memref<2x10x10x8xf32, #tpu.memory_space<vmem>>, vector<2x10x10x8xf32>,
    %17 = vector.shape_cast %14 : vector<128x8xf32> to vector<2x8x8x8xf32>
    %c0_11 = arith.constant 0 : index
    %c1 = arith.constant 1 : index
    %c1_12 = arith.constant 1 : index
    %c0_13 = arith.constant 0 : index
    %18 = vector.load %arg8[%c0_11, %c1, %c1_12, %c0_13] : memref<2x10x10x8xf32, #tpu.memory_space<vmem>>, vector<2x8x8x8xf32>
    tpu.vector_store %arg8[%c0_11, %c1, %c1_12, %c0_13], %17 {strides = array<i32>} : memref<2x10x10x8xf32, #tpu.memory_space<vmem>>, vector<2x8x8x8xf32>,
    %c0_14 = arith.constant 0 : index
    %c0_15 = arith.constant 0 : index
    %c0_16 = arith.constant 0 : index
    %c0_17 = arith.constant 0 : index
    %19 = vector.load %arg8[%c0_14, %c0_15, %c0_16, %c0_17] : memref<2x10x10x8xf32, #tpu.memory_space<vmem>>, vector<2x8x8x8xf32>
    %20 = vector.shape_cast %19 : vector<2x8x8x8xf32> to vector<128x8xf32>
    %c0_18 = arith.constant 0 : index
    %c0_19 = arith.constant 0 : index
    %c1_20 = arith.constant 1 : index
    %c0_21 = arith.constant 0 : index
    %21 = vector.load %arg8[%c0_18, %c0_19, %c1_20, %c0_21] : memref<2x10x10x8xf32, #tpu.memory_space<vmem>>, vector<2x8x8x8xf32>
    %22 = vector.shape_cast %21 : vector<2x8x8x8xf32> to vector<128x8xf32>
    %c0_22 = arith.constant 0 : index
    %c0_23 = arith.constant 0 : index
    %c2 = arith.constant 2 : index
    %c0_24 = arith.constant 0 : index
    %23 = vector.load %arg8[%c0_22, %c0_23, %c2, %c0_24] : memref<2x10x10x8xf32, #tpu.memory_space<vmem>>, vector<2x8x8x8xf32>
    %24 = vector.shape_cast %23 : vector<2x8x8x8xf32> to vector<128x8xf32>
    %c0_25 = arith.constant 0 : index
    %c1_26 = arith.constant 1 : index
    %c0_27 = arith.constant 0 : index
    %c0_28 = arith.constant 0 : index
    %25 = vector.load %arg8[%c0_25, %c1_26, %c0_27, %c0_28] : memref<2x10x10x8xf32, #tpu.memory_space<vmem>>, vector<2x8x8x8xf32>
    %26 = vector.shape_cast %25 : vector<2x8x8x8xf32> to vector<128x8xf32>
    %c0_29 = arith.constant 0 : index
    %c1_30 = arith.constant 1 : index
    %c1_31 = arith.constant 1 : index
    %c0_32 = arith.constant 0 : index
    %27 = vector.load %arg8[%c0_29, %c1_30, %c1_31, %c0_32] : memref<2x10x10x8xf32, #tpu.memory_space<vmem>>, vector<2x8x8x8xf32>
    %28 = vector.shape_cast %27 : vector<2x8x8x8xf32> to vector<128x8xf32>
    %c0_33 = arith.constant 0 : index
    %c1_34 = arith.constant 1 : index
    %c2_35 = arith.constant 2 : index
    %c0_36 = arith.constant 0 : index
    %29 = vector.load %arg8[%c0_33, %c1_34, %c2_35, %c0_36] : memref<2x10x10x8xf32, #tpu.memory_space<vmem>>, vector<2x8x8x8xf32>
    %30 = vector.shape_cast %29 : vector<2x8x8x8xf32> to vector<128x8xf32>
    %c0_37 = arith.constant 0 : index
    %c2_38 = arith.constant 2 : index
    %c0_39 = arith.constant 0 : index
    %c0_40 = arith.constant 0 : index
    %31 = vector.load %arg8[%c0_37, %c2_38, %c0_39, %c0_40] : memref<2x10x10x8xf32, #tpu.memory_space<vmem>>, vector<2x8x8x8xf32>
    %32 = vector.shape_cast %31 : vector<2x8x8x8xf32> to vector<128x8xf32>
    %c0_41 = arith.constant 0 : index
    %c2_42 = arith.constant 2 : index
    %c1_43 = arith.constant 1 : index
    %c0_44 = arith.constant 0 : index
    %33 = vector.load %arg8[%c0_41, %c2_42, %c1_43, %c0_44] : memref<2x10x10x8xf32, #tpu.memory_space<vmem>>, vector<2x8x8x8xf32>
    %34 = vector.shape_cast %33 : vector<2x8x8x8xf32> to vector<128x8xf32>
    %c0_45 = arith.constant 0 : index
    %c2_46 = arith.constant 2 : index
    %c2_47 = arith.constant 2 : index
    %c0_48 = arith.constant 0 : index
    %35 = vector.load %arg8[%c0_45, %c2_46, %c2_47, %c0_48] : memref<2x10x10x8xf32, #tpu.memory_space<vmem>>, vector<2x8x8x8xf32>
    %36 = vector.shape_cast %35 : vector<2x8x8x8xf32> to vector<128x8xf32>
    %37 = tpu.concatenate %20, %22, %24, %26, %28, %30, %32, %34, %36 in 1 : vector<128x8xf32>, vector<128x8xf32>, vector<128x8xf32>, vector<128x8xf32>, vector<128x8xf32>, vector<128x8xf32>, vector<128x8xf32>, vector<128x8xf32>, vector<128x8xf32> -> vector<128x72xf32>
    %c0_49 = arith.constant 0 : index
    %c0_50 = arith.constant 0 : index
    %38 = vector.load %arg3[%c0_49, %c0_50] : memref<72x16xf32, #tpu.memory_space<vmem>>, vector<72x16xf32>
    %cst_51 = arith.constant dense<0.000000e+00> : vector<128x16xf32>
    %39 = tpu.matmul %37, %38, %cst_51 {dimension_numbers = #tpu.dot_dimension_numbers<[1], [0], [0], [1], [0, 0, 1, 1], [], []>} : vector<128x72xf32>, vector<72x16xf32>, vector<128x16xf32> -> vector<128x16xf32>
    %40 = tpu.transpose %39, [1, 0] : vector<128x16xf32> -> vector<16x128xf32>
    %c0_52 = arith.constant 0 : index
    %c0_53 = arith.constant 0 : index
    %41 = vector.load %arg4[%c0_52, %c0_53] : memref<16x1xf32, #tpu.memory_space<vmem>>, vector<16x1xf32>
    %42 = vector.broadcast %41 : vector<16x1xf32> to vector<16x128xf32>
    %43 = arith.addf %40, %42 : vector<16x128xf32>
    %cst_54 = arith.constant dense<0.000000e+00> : vector<16xf32>
    %44 = vector.multi_reduction <add>, %43, %cst_54 [1] : vector<16x128xf32> to vector<16xf32>
    %45 = vector.shape_cast %44 : vector<16xf32> to vector<16x1xf32>
    %cst_55 = arith.constant 7.812500e-03 : f32
    %46 = vector.broadcast %cst_55 : f32 to vector<16x1xf32>
    %47 = arith.mulf %45, %46 : vector<16x1xf32>
    %48 = arith.mulf %43, %43 : vector<16x128xf32>
    %cst_56 = arith.constant dense<0.000000e+00> : vector<16xf32>
    %49 = vector.multi_reduction <add>, %48, %cst_56 [1] : vector<16x128xf32> to vector<16xf32>
    %50 = vector.shape_cast %49 : vector<16xf32> to vector<16x1xf32>
    %cst_57 = arith.constant 7.812500e-03 : f32
    %51 = vector.broadcast %cst_57 : f32 to vector<16x1xf32>
    %52 = arith.mulf %50, %51 : vector<16x1xf32>
    %53 = arith.mulf %47, %47 : vector<16x1xf32>
    %54 = arith.subf %52, %53 : vector<16x1xf32>
    %cst_58 = arith.constant 0.000000e+00 : f32
    %55 = vector.broadcast %cst_58 : f32 to vector<16x1xf32>
    %56 = arith.maximumf %54, %55 : vector<16x1xf32>
    %c0_59 = arith.constant 0 : index
    %c0_60 = arith.constant 0 : index
    %57 = vector.load %arg5[%c0_59, %c0_60] : memref<16x1xf32, #tpu.memory_space<vmem>>, vector<16x1xf32>
    %cst_61 = arith.constant 9.99999974E-6 : f32
    %58 = vector.broadcast %cst_61 : f32 to vector<16x1xf32>
    %59 = arith.addf %56, %58 : vector<16x1xf32>
    %60 = math.rsqrt %59 : vector<16x1xf32>
    %61 = arith.mulf %57, %60 : vector<16x1xf32>
    %c0_62 = arith.constant 0 : index
    %c0_63 = arith.constant 0 : index
    %62 = vector.load %arg6[%c0_62, %c0_63] : memref<16x1xf32, #tpu.memory_space<vmem>>, vector<16x1xf32>
    %63 = arith.mulf %47, %61 : vector<16x1xf32>
    %64 = arith.subf %62, %63 : vector<16x1xf32>
    %65 = vector.broadcast %61 : vector<16x1xf32> to vector<16x128xf32>
    %66 = arith.mulf %43, %65 : vector<16x128xf32>
    %67 = vector.broadcast %64 : vector<16x1xf32> to vector<16x128xf32>
    %68 = arith.addf %66, %67 : vector<16x128xf32>
    %cst_64 = arith.constant 0.000000e+00 : f32
    %69 = vector.broadcast %cst_64 : f32 to vector<16x128xf32>
    %70 = arith.maximumf %68, %69 : vector<16x128xf32>
    %c0_65 = arith.constant 0 : index
    %c0_66 = arith.constant 0 : index
    %71 = vector.load %arg7[%c0_65, %c0_66] : memref<16x128xf32, #tpu.memory_space<vmem>>, vector<16x128xf32>
    tpu.vector_store %arg7[%c0_65, %c0_66], %70 {strides = array<i32>} : memref<16x128xf32, #tpu.memory_space<vmem>>, vector<16x128xf32>,
    return
  }
}

</mosaic_0001>

<bundles_post_ra>
// kernel: cnn_forward.1
= control target key start
LH: loop header
LB: loop body
LE: loop exit
PB: predicated region body
PF: predicated region fallthrough
CT: control target
= control target key end

     0   :  { %vm292_vm0 = vcmask 1043456   ;;  %vm99_vm1 = vcmask 293888   ;;  %vm617_vm2 = vcmask 64512   ;;  %vm619_vm3 = vcmask 58368   ;;  %s1837_s20 = smov 64   ;;  %s1838_s21 = smov 48   ;;  %s3000_s1 = inlined_call_operand.vmem [shape: f32[36,8], index: 1, kind: input, shape index: {}]   ;;  %s3001_s0 = inlined_call_operand.vmem [shape: f32[512,36], index: 0, kind: input, shape index: {}]   ;;  %s3002_s2 = inlined_call_operand.vmem [shape: f32[1,8], index: 2, kind: input, shape index: {}]   ;;  %s3003_s3 = inlined_call_operand.vmem [shape: f32[72,16], index: 3, kind: input, shape index: {}]   ;;  %s3004_s4 = inlined_call_operand.vmem [shape: f32[16,1], index: 4, kind: input, shape index: {}]   ;;  %s3005_s5 = inlined_call_operand.vmem [shape: f32[16,1], index: 5, kind: input, shape index: {}]   ;;  %s3006_s6 = inlined_call_operand.vmem [shape: f32[16,1], index: 6, kind: input, shape index: {}]   ;;  %s3007_s7 = inlined_call_operand.vmem [shape: f32[16,128], index: 7, kind: output, shape index: {}]  }
   0x1   :  { %v94_v0 = vld [vmem:[%s3000_s1 + $0x20] sm:$0xf]  ;;  %v93_v1 = vld [vmem:[%s3000_s1 + $0x18] sm:$0xff]  ;;  %v92_v2 = vld [vmem:[%s3000_s1 + $0x10] sm:$0xff]  ;;  %s1839_s22 = smov 56   ;;  %s1840_s23 = smov 40  }
   0x2   :  { %1721 = vmatpush.msk.msra.mxu0 %vm292_vm0, %v94_v0  ;;  %1803 = vmatpush.msk.msra.mxu2 %vm292_vm0, %v94_v0  ;;  %v91_v3 = vld [vmem:[%s3000_s1 + $0x8] sm:$0xff]  ;;  %v90_v4 = vld [vmem:[%s3000_s1] sm:$0xff]  ;;  %v49_v6 = vld [vmem:[%s3001_s0 + $0xb8] sm:$0xff]  ;;  %s1841_s24 = smov 24   ;;  %s1842_s25 = smov 32   ;;  %vm1349_vm4 = vcmask 130048  }
   0x3   :  { %1804 = vmatpush.msk.msra.mxu3 %vm292_vm0, %v94_v0  ;;  %1802 = vmatpush.msk.msra.mxu1 %vm292_vm0, %v94_v0  ;;  %v26_v5 = vld [vmem:[%s3001_s0] sm:$0xff]  ;;  %v27_v8 = vld [vmem:[%s3001_s0 + $0x8] sm:$0xff]  ;;  %v28_v11 = vld [vmem:[%s3001_s0 + $0x10] sm:$0xff]  ;;  %vm1366_vm5 = vcmask 195584   ;;  %vm1383_vm6 = vcmask 261120   ;;  %vm1400_vm7 = vcmask 326656  }
   0x4   :  { %308 = vmatpush.msra.mxu0 %v93_v1  ;;  %1806 = vmatpush.msra.mxu2 %v93_v1  ;;  %v70_v7 = vld [vmem:[%s3001_s0 + $0x160] sm:$0xff]  ;;  %v71_v10 = vld [vmem:[%s3001_s0 + $0x168] sm:$0xff]  ;;  %v72_v13 = vld [vmem:[%s3001_s0 + $0x170] sm:$0xff]  ;;  %vm1417_vm8 = vcmask 392192   ;;  %vm1434_vm9 = vcmask 457728   ;;  %vm1451_vm10 = vcmask 523264  }
   0x5   :  { %1807 = vmatpush.msra.mxu3 %v93_v1  ;;  %1805 = vmatpush.msra.mxu1 %v93_v1  ;;  %v50_v9 = vld [vmem:[%s3001_s0 + $0xc0] sm:$0xff]  ;;  %v51_v12 = vld [vmem:[%s3001_s0 + $0xc8] sm:$0xff]  ;;  %v29_v14 = vld [vmem:[%s3001_s0 + $0x18] sm:$0xff]  ;;  %vm1477_vm11 = vcmask 588800  }
   0x6   :  { %309 = vmatpush.msra.mxu0 %v92_v2  ;;  %1809 = vmatpush.msra.mxu2 %v92_v2  ;;  %v52_v15 = vld [vmem:[%s3001_s0 + $0xd0] sm:$0xff]  ;;  %v73_v16 = vld [vmem:[%s3001_s0 + $0x178] sm:$0xff]  ;;  %v30_v17 = vld [vmem:[%s3001_s0 + $0x20] sm:$0xff] }
   0x7   :  { %1810 = vmatpush.msra.mxu3 %v92_v2  ;;  %1808 = vmatpush.msra.mxu1 %v92_v2  ;;  %v53_v18 = vld [vmem:[%s3001_s0 + $0xd8] sm:$0xff]  ;;  %v74_v19 = vld [vmem:[%s3001_s0 + $0x180] sm:$0xff]  ;;  %v31_v20 = vld [vmem:[%s3001_s0 + $0x28] sm:$0xff] }
   0x8   :  { %310 = vmatpush.msra.mxu0 %v91_v3  ;;  %1812 = vmatpush.msra.mxu2 %v91_v3  ;;  %v54_v21 = vld [vmem:[%s3001_s0 + $0xe0] sm:$0xff]  ;;  %v75_v22 = vld [vmem:[%s3001_s0 + $0x188] sm:$0xff]  ;;  %v32_v24 = vld [vmem:[%s3001_s0 + $0x30] sm:$0xff] }
   0x9   :  { %1813 = vmatpush.msra.mxu3 %v91_v3  ;;  %1811 = vmatpush.msra.mxu1 %v91_v3  ;;  %v46_v23 = vld [vmem:[%s3001_s0 + $0xa0] sm:$0xff]  ;;  %v55_v25 = vld [vmem:[%s3001_s0 + $0xe8] sm:$0xff]  ;;  %v76_v26 = vld [vmem:[%s3001_s0 + $0x190] sm:$0xff] }
   0xa   :  { %311 = vmatpush.msra.mxu0 %v90_v4  ;;  %1815 = vmatpush.msra.mxu2 %v90_v4  ;;  %v47_v27 = vld [vmem:[%s3001_s0 + $0xa8] sm:$0xff]  ;;  %v33_v28 = vld [vmem:[%s3001_s0 + $0x38] sm:$0xff]  ;;  %v56_v29 = vld [vmem:[%s3001_s0 + $0xf0] sm:$0xff] }
   0xb   :  { %1816 = vmatpush.msra.mxu3 %v90_v4  ;;  %1722 = vmatmul.msk.f32.vlgmr.msra.gmra.mxu0 %vm99_vm1, %v26_v5  ;;  %v77_v30 = vld [vmem:[%s3001_s0 + $0x198] sm:$0xff]  ;;  %v48_v31 = vld [vmem:[%s3001_s0 + $0xb0] sm:$0xff]  ;;  %v34_v32 = vld [vmem:[%s3001_s0 + $0x40] sm:$0xff] }
   0xc   :  { %1745 = vmatmul.msk.f32.vlgmr.msra.gmra.mxu2 %vm99_vm1, %v49_v6  ;;  %1766 = vmatmul.msk.f32.vlgmr.msra.gmra.mxu3 %vm99_vm1, %v70_v7  ;;  %v57_v33 = vld [vmem:[%s3001_s0 + $0xf8] sm:$0xff]  ;;  %v78_v34 = vld [vmem:[%s3001_s0 + $0x1a0] sm:$0xff]  ;;  %v35_v35 = vld [vmem:[%s3001_s0 + $0x48] sm:$0xff] }
   0xd   :  { %1814 = vmatpush.msra.mxu1 %v90_v4  ;;  %v58_v36 = vld [vmem:[%s3001_s0 + $0x100] sm:$0xff]  ;;  %v79_v37 = vld [vmem:[%s3001_s0 + $0x1a8] sm:$0xff]  ;;  %v36_v38 = vld [vmem:[%s3001_s0 + $0x50] sm:$0xff] }
   0xe   :  { %1742 = vmatmul.msk.f32.vlgmr.msra.gmra.mxu1 %vm99_vm1, %v46_v23  ;;  %v59_v39 = vld [vmem:[%s3001_s0 + $0x108] sm:$0xff]  ;;  %v80_v40 = vld [vmem:[%s3001_s0 + $0x1b0] sm:$0xff]  ;;  %v37_v41 = vld [vmem:[%s3001_s0 + $0x58] sm:$0xff] }
   0xf   :  { %v60_v42 = vld [vmem:[%s3001_s0 + $0x110] sm:$0xff]  ;;  %v81_v43 = vld [vmem:[%s3001_s0 + $0x1b8] sm:$0xff]  ;;  %v38_v44 = vld [vmem:[%s3001_s0 + $0x60] sm:$0xff] }
  0x10   :  { %v61_v45 = vld [vmem:[%s3001_s0 + $0x118] sm:$0xff]  ;;  %v82_v46 = vld [vmem:[%s3001_s0 + $0x1c0] sm:$0xff]  ;;  %v39_v47 = vld [vmem:[%s3001_s0 + $0x68] sm:$0xff] }
  0x11   :  { %v62_v48 = vld [vmem:[%s3001_s0 + $0x120] sm:$0xff]  ;;  %v83_v49 = vld [vmem:[%s3001_s0 + $0x1c8] sm:$0xff]  ;;  %v40_v50 = vld [vmem:[%s3001_s0 + $0x70] sm:$0xff] }
  0x12   :  { %v63_v51 = vld [vmem:[%s3001_s0 + $0x128] sm:$0xff]  ;;  %v84_v52 = vld [vmem:[%s3001_s0 + $0x1d0] sm:$0xff]  ;;  %v41_v53 = vld [vmem:[%s3001_s0 + $0x78] sm:$0xff] }
  0x13   :  { %1723 = vmatmul.msk.f32.gmra.mxu0 %vm99_vm1, %v27_v8  ;;  %v64_v54 = vld [vmem:[%s3001_s0 + $0x130] sm:$0xff]  ;;  %v85_v55 = vld [vmem:[%s3001_s0 + $0x1d8] sm:$0xff]  ;;  %v42_v57 = vld [vmem:[%s3001_s0 + $0x80] sm:$0xff] }
  0x14   :  { %1746 = vmatmul.msk.f32.gmra.mxu2 %vm99_vm1, %v50_v9  ;;  %1767 = vmatmul.msk.f32.gmra.mxu3 %vm99_vm1, %v71_v10  ;;  %v65_v58 = vld [vmem:[%s3001_s0 + $0x138] sm:$0xff]  ;;  %v86_v59 = vld [vmem:[%s3001_s0 + $0x1e0] sm:$0xff]  ;;  %v43_v63 = vld [vmem:[%s3001_s0 + $0x88] sm:$0xff] }
  0x15   :  { %v66_v0 = vld [vmem:[%s3001_s0 + $0x140] sm:$0xff]  ;;  %v87_v1 = vld [vmem:[%s3001_s0 + $0x1e8] sm:$0xff]  ;;  %v44_v5 = vld [vmem:[%s3001_s0 + $0x90] sm:$0xff] }
  0x16   :  { %1743 = vmatmul.msk.f32.gmra.mxu1 %vm99_vm1, %v47_v27  ;;  %v67_v6 = vld [vmem:[%s3001_s0 + $0x148] sm:$0xff]  ;;  %v88_v7 = vld [vmem:[%s3001_s0 + $0x1f0] sm:$0xff] }
  0x1b   :  { %1724 = vmatmul.msk.f32.gmra.mxu0 %vm99_vm1, %v28_v11  ;;  %v45_v11 = vld [vmem:[%s3001_s0 + $0x98] sm:$0xff] }
  0x1c   :  { %1747 = vmatmul.msk.f32.gmra.mxu2 %vm99_vm1, %v51_v12  ;;  %1768 = vmatmul.msk.f32.gmra.mxu3 %vm99_vm1, %v72_v13  ;;  %v68_v12 = vld [vmem:[%s3001_s0 + $0x150] sm:$0xff]  ;;  %v89_v13 = vld [vmem:[%s3001_s0 + $0x1f8] sm:$0xff] }
  0x1e   :  { %1744 = vmatmul.msk.f32.gmra.mxu1 %vm99_vm1, %v48_v31 }
  0x23   :  { %1725 = vmatmul.msk.f32.gmra.mxu0 %vm99_vm1, %v29_v14 }
  0x24   :  { %1748 = vmatmul.msk.f32.gmra.mxu2 %vm99_vm1, %v52_v15  ;;  %1769 = vmatmul.msk.f32.gmra.mxu3 %vm99_vm1, %v73_v16 }
  0x2b   :  { %1726 = vmatmul.msk.f32.gmra.mxu0 %vm99_vm1, %v30_v17  ;;  %v69_v17 = vld [vmem:[%s3001_s0 + $0x158] sm:$0xff]  ;;  %s1835_s0 = smov 8  }
  0x2c   :  { %1749 = vmatmul.msk.f32.gmra.mxu2 %vm99_vm1, %v53_v18  ;;  %1770 = vmatmul.msk.f32.gmra.mxu3 %vm99_vm1, %v74_v19 }
  0x33   :  { %1727 = vmatmul.msk.f32.gmra.mxu0 %vm99_vm1, %v31_v20 }
  0x34   :  { %1750 = vmatmul.msk.f32.gmra.mxu2 %vm99_vm1, %v54_v21  ;;  %1771 = vmatmul.msk.f32.gmra.mxu3 %vm99_vm1, %v75_v22 }
  0x3b   :  { %1728 = vmatmul.msk.f32.gmra.mxu0 %vm99_vm1, %v32_v24  ;;  %v2188_v24 = vld [vmem:[%s3002_s2] ss:$0 sm:$0xff]  ;;  %s1836_s2 = smov 16  }
  0x3c   :  { %1751 = vmatmul.msk.f32.gmra.mxu2 %vm99_vm1, %v55_v25  ;;  %1772 = vmatmul.msk.f32.gmra.mxu3 %vm99_vm1, %v76_v26 }
  0x43   :  { %1729 = vmatmul.msk.f32.gmra.mxu0 %vm99_vm1, %v33_v28 }
  0x44   :  { %1752 = vmatmul.msk.f32.gmra.mxu2 %vm99_vm1, %v56_v29  ;;  %1773 = vmatmul.msk.f32.gmra.mxu3 %vm99_vm1, %v77_v30 }
  0x4b   :  { %1730 = vmatmul.msk.f32.gmra.mxu0 %vm99_vm1, %v34_v32 }
  0x4c   :  { %1753 = vmatmul.msk.f32.gmra.mxu2 %vm99_vm1, %v57_v33  ;;  %1774 = vmatmul.msk.f32.gmra.mxu3 %vm99_vm1, %v78_v34 }
  0x53   :  { %1731 = vmatmul.msk.f32.gmra.mxu0 %vm99_vm1, %v35_v35 }
  0x54   :  { %1754 = vmatmul.msk.f32.gmra.mxu2 %vm99_vm1, %v58_v36  ;;  %1775 = vmatmul.msk.f32.gmra.mxu3 %vm99_vm1, %v79_v37  ;;  %v1834_v37 = vmov 0.0  }
  0x55   :  { %618 = vst.msk [vmem:[#allocation2] sm:$0xff] %vm617_vm2, %v1834_v37 }
  0x56   :  { %620 = vst.msk [vmem:[#allocation2 + $0x8] sm:$0x3] %vm619_vm3, %v1834_v37 }
  0x57   :  { %621 = vst.msk [vmem:[#allocation2 + $0x10] sm:$0xff] %vm617_vm2, %v1834_v37 }
  0x58   :  { %622 = vst.msk [vmem:[#allocation2 + $0x18] sm:$0x3] %vm619_vm3, %v1834_v37 }
  0x59   :  { %623 = vst.msk [vmem:[#allocation2 + $0x20] sm:$0xff] %vm617_vm2, %v1834_v37 }
  0x5a   :  { %624 = vst.msk [vmem:[#allocation2 + $0x28] sm:$0x3] %vm619_vm3, %v1834_v37 }
  0x5b   :  { %1732 = vmatmul.msk.f32.gmra.mxu0 %vm99_vm1, %v36_v38  ;;  %625 = vst.msk [vmem:[#allocation2 + $0x30] sm:$0xff] %vm617_vm2, %v1834_v37 }
  0x5c   :  { %1755 = vmatmul.msk.f32.gmra.mxu2 %vm99_vm1, %v59_v39  ;;  %1776 = vmatmul.msk.f32.gmra.mxu3 %vm99_vm1, %v80_v40  ;;  %626 = vst.msk [vmem:[#allocation2 + $0x38] sm:$0x3] %vm619_vm3, %v1834_v37 }
  0x5d   :  { %627 = vst.msk [vmem:[#allocation2 + $0x40] sm:$0xff] %vm617_vm2, %v1834_v37 }
  0x5e   :  { %628 = vst.msk [vmem:[#allocation2 + $0x48] sm:$0x3] %vm619_vm3, %v1834_v37 }
  0x5f   :  { %629 = vst.msk [vmem:[#allocation2 + $0x50] sm:$0xff] %vm617_vm2, %v1834_v37 }
  0x60   :  { %630 = vst.msk [vmem:[#allocation2 + $0x58] sm:$0x3] %vm619_vm3, %v1834_v37 }
  0x61   :  { %631 = vst.msk [vmem:[#allocation2 + $0x60] sm:$0xff] %vm617_vm2, %v1834_v37 }
  0x62   :  { %632 = vst.msk [vmem:[#allocation2 + $0x68] sm:$0x3] %vm619_vm3, %v1834_v37 }
  0x63   :  { %1733 = vmatmul.msk.f32.gmra.mxu0 %vm99_vm1, %v37_v41  ;;  %633 = vst.msk [vmem:[#allocation2 + $0x70] sm:$0xff] %vm617_vm2, %v1834_v37 }
  0x64   :  { %1756 = vmatmul.msk.f32.gmra.mxu2 %vm99_vm1, %v60_v42  ;;  %1777 = vmatmul.msk.f32.gmra.mxu3 %vm99_vm1, %v81_v43  ;;  %634 = vst.msk [vmem:[#allocation2 + $0x78] sm:$0x3] %vm619_vm3, %v1834_v37 }
  0x65   :  { %635 = vst.msk [vmem:[#allocation2 + $0x80] sm:$0xff] %vm617_vm2, %v1834_v37 }
  0x66   :  { %636 = vst.msk [vmem:[#allocation2 + $0x88] sm:$0x3] %vm619_vm3, %v1834_v37 }
  0x67   :  { %637 = vst.msk [vmem:[#allocation2 + $0x90] sm:$0xff] %vm617_vm2, %v1834_v37 }
  0x68   :  { %638 = vst.msk [vmem:[#allocation2 + $0x98] sm:$0x3] %vm619_vm3, %v1834_v37 }
  0x69   :  { %639 = vst.msk [vmem:[#allocation2 + $0xa0] sm:$0xff] %vm617_vm2, %v1834_v37 }
  0x6a   :  { %640 = vst.msk [vmem:[#allocation2 + $0xa8] sm:$0x3] %vm619_vm3, %v1834_v37 }
  0x6b   :  { %1734 = vmatmul.msk.f32.gmra.mxu0 %vm99_vm1, %v38_v44  ;;  %641 = vst.msk [vmem:[#allocation2 + $0xb0] sm:$0xff] %vm617_vm2, %v1834_v37 }
  0x6c   :  { %1757 = vmatmul.msk.f32.gmra.mxu2 %vm99_vm1, %v61_v45  ;;  %1778 = vmatmul.msk.f32.gmra.mxu3 %vm99_vm1, %v82_v46  ;;  %v692_v46 = vld [vmem:[#allocation2 + $0x1] sm:$0xff]  ;;  %642 = vst.msk [vmem:[#allocation2 + $0xb8] sm:$0x3] %vm619_vm3, %v1834_v37 }
  0x6d   :  { %837 = vrot.lane.b32.xlu0 %v692_v46, %s1835_s0  ;;  %643 = vst.msk [vmem:[#allocation2 + $0xc0] sm:$0xff] %vm617_vm2, %v1834_v37 }
  0x6e   :  { %644 = vst.msk [vmem:[#allocation2 + $0xc8] sm:$0x3] %vm619_vm3, %v1834_v37 }
  0x6f   :  { %645 = vst.msk [vmem:[#allocation2 + $0xd0] sm:$0xff] %vm617_vm2, %v1834_v37 }
  0x70   :  { %646 = vst.msk [vmem:[#allocation2 + $0xd8] sm:$0x3] %vm619_vm3, %v1834_v37 }
  0x71   :  { %647 = vst.msk [vmem:[#allocation2 + $0xe0] sm:$0xff] %vm617_vm2, %v1834_v37 }
  0x72   :  { %648 = vst.msk [vmem:[#allocation2 + $0xe8] sm:$0x3] %vm619_vm3, %v1834_v37 }
  0x73   :  { %1735 = vmatmul.msk.f32.gmra.mxu0 %vm99_vm1, %v39_v47  ;;  %649 = vst.msk [vmem:[#allocation2 + $0xf0] sm:$0xff] %vm617_vm2, %v1834_v37 }
  0x74   :  { %1758 = vmatmul.msk.f32.gmra.mxu2 %vm99_vm1, %v62_v48  ;;  %1779 = vmatmul.msk.f32.gmra.mxu3 %vm99_vm1, %v83_v49  ;;  %650 = vst.msk [vmem:[#allocation2 + $0xf8] sm:$0x3] %vm619_vm3, %v1834_v37 }
  0x75   :  { %651 = vst.msk [vmem:[#allocation2 + $0x100] sm:$0xff] %vm617_vm2, %v1834_v37 }
  0x76   :  { %652 = vst.msk [vmem:[#allocation2 + $0x108] sm:$0x3] %vm619_vm3, %v1834_v37 }
  0x77   :  { %653 = vst.msk [vmem:[#allocation2 + $0x110] sm:$0xff] %vm617_vm2, %v1834_v37 }
  0x78   :  { %654 = vst.msk [vmem:[#allocation2 + $0x118] sm:$0x3] %vm619_vm3, %v1834_v37 }
  0x79   :  { %655 = vst.msk [vmem:[#allocation2 + $0x120] sm:$0xff] %vm617_vm2, %v1834_v37 }
  0x7a   :  { %656 = vst.msk [vmem:[#allocation2 + $0x128] sm:$0x3] %vm619_vm3, %v1834_v37 }
  0x7b   :  { %1736 = vmatmul.msk.f32.gmra.mxu0 %vm99_vm1, %v40_v50  ;;  %657 = vst.msk [vmem:[#allocation2 + $0x130] sm:$0xff] %vm617_vm2, %v1834_v37 }
  0x7c   :  { %1759 = vmatmul.msk.f32.gmra.mxu2 %vm99_vm1, %v63_v51  ;;  %1780 = vmatmul.msk.f32.gmra.mxu3 %vm99_vm1, %v84_v52  ;;  %658 = vst.msk [vmem:[#allocation2 + $0x138] sm:$0x3] %vm619_vm3, %v1834_v37 }
  0x83   :  { %1737 = vmatmul.msk.f32.gmra.mxu0 %vm99_vm1, %v41_v53 }
  0x84   :  { %1760 = vmatmul.msk.f32.gmra.mxu2 %vm99_vm1, %v64_v54  ;;  %1781 = vmatmul.msk.f32.gmra.mxu3 %vm99_vm1, %v85_v55  ;;  %v708_v54 = vld [vmem:[#allocation2 + $0x2] sm:$0xff] }
  0x85   :  { %901 = vrot.lane.b32.xlu1 %v708_v54, %s1836_s2 }
  0x88   :  { %v2103_v56 = vpop.f32.mrf.mxu0 }
  0x8b   :  { %1738 = vmatmul.msk.f32.gmra.mxu0 %vm99_vm1, %v42_v57 }
  0x8c   :  { %1761 = vmatmul.msk.f32.gmra.mxu2 %vm99_vm1, %v65_v58  ;;  %1782 = vmatmul.msk.f32.gmra.mxu3 %vm99_vm1, %v86_v59 }
  0x8f   :  { %v382_v60 = vpop.f32.mrf.mxu2  ;;  %v2117_v61 = vpop.f32.mrf.mxu3 }
  0x90   :  { %v2119_v62 = vpop.f32.mrf.mxu0  ;;  %v383_v25 = vadd.f32 %v2188_v24, %v382_v60 }
  0x92   :  { %v528_v30 = vmax.f32 %v383_v25, 0.0  ;;  %v780_v25 = vld [vmem:[#allocation2 + $0x90] sm:$0xff] }
  0x93   :  { %1739 = vmatmul.msk.f32.gmra.mxu0 %vm99_vm1, %v43_v63 }
  0x94   :  { %1762 = vmatmul.msk.f32.gmra.mxu2 %vm99_vm1, %v66_v0  ;;  %1783 = vmatmul.msk.f32.gmra.mxu3 %vm99_vm1, %v87_v1 }
  0x97   :  { %v385_v2 = vpop.f32.mrf.mxu2  ;;  %v2133_v3 = vpop.f32.mrf.mxu3 }
  0x98   :  { %v2135_v4 = vpop.f32.mrf.mxu0  ;;  %v386_v33 = vadd.f32 %v2188_v24, %v385_v2 }
  0x9a   :  { %v529_v39 = vmax.f32 %v386_v33, 0.0 }
  0x9b   :  { %1740 = vmatmul.msk.f32.gmra.mxu0 %vm99_vm1, %v44_v5 }
  0x9c   :  { %1763 = vmatmul.msk.f32.gmra.mxu2 %vm99_vm1, %v67_v6  ;;  %1784 = vmatmul.msk.f32.gmra.mxu3 %vm99_vm1, %v88_v7  ;;  %v812_v6 = vld [vmem:[#allocation2 + $0x92] sm:$0xff] }
  0x9d   :  { %1299 = vrot.lane.b32.xlu1 %v812_v6, %s1837_s20 }
  0x9f   :  { %v388_v8 = vpop.f32.mrf.mxu2  ;;  %v2149_v9 = vpop.f32.mrf.mxu3 }
  0xa0   :  { %v2151_v10 = vpop.f32.mrf.mxu0  ;;  %v389_v42 = vadd.f32 %v2188_v24, %v388_v8 }
  0xa2   :  { %v530_v48 = vmax.f32 %v389_v42, 0.0 }
  0xa3   :  { %1741 = vmatmul.msk.f32.gmra.mxu0 %vm99_vm1, %v45_v11  ;;  %v700_v11 = vld [vmem:[#allocation2 + $0xa1] sm:$0xff] }
  0xa4   :  { %1764 = vmatmul.msk.f32.gmra.mxu2 %vm99_vm1, %v68_v12  ;;  %1785 = vmatmul.msk.f32.gmra.mxu3 %vm99_vm1, %v89_v13  ;;  %v716_v12 = vld [vmem:[#allocation2 + $0xa2] sm:$0xff] }
  0xa5   :  { %853 = vrot.lane.b32.xlu2 %v700_v11, %s1835_s0  ;;  %917 = vrot.lane.b32.xlu0 %v716_v12, %s1836_s2 }
  0xa7   :  { %v391_v14 = vpop.f32.mrf.mxu2  ;;  %v2165_v15 = vpop.f32.mrf.mxu3 }
  0xa8   :  { %v2167_v16 = vpop.f32.mrf.mxu0  ;;  %v392_v51 = vadd.f32 %v2188_v24, %v391_v14 }
  0xaa   :  { %v531_v58 = vmax.f32 %v392_v51, 0.0 }
  0xac   :  { %1765 = vmatmul.msk.f32.gmra.mxu2 %vm99_vm1, %v69_v17 }
  0xad   :  { %1171 = vrot.lane.b32.xlu2 %v780_v25, %s1838_s21 }
  0xaf   :  { %v2173_v18 = vpop.f32.mrf.mxu2  ;;  %v2175_v19 = vpop.f32.mrf.mxu3 }
  0xb0   :  { %v2177_v20 = vpop.f32.mrf.mxu0  ;;  %v395_v63 = vadd.f32 %v2188_v24, %v2173_v18 }
  0xb2   :  { %v532_v7 = vmax.f32 %v395_v63, 0.0 }
  0xb7   :  { %v2179_v21 = vpop.f32.mrf.mxu2  ;;  %v2181_v22 = vpop.f32.mrf.mxu3 }
  0xb8   :  { %v2183_v23 = vpop.f32.mrf.mxu0 }
  0xbf   :  { %v2191_v26 = vpop.f32.mrf.mxu2  ;;  %v2193_v27 = vpop.f32.mrf.mxu3 }
  0xc0   :  { %v334_v28 = vpop.f32.mrf.mxu0 }
  0xc1   :  { %v335_v29 = vadd.f32 %v2188_v24, %v334_v28  ;;  %v796_v28 = vld [vmem:[#allocation2 + $0x91] sm:$0xff] }
  0xc2   :  { %1235 = vrot.lane.b32.xlu0 %v796_v28, %s1839_s22 }
  0xc3   :  { %v512_v31 = vmax.f32 %v335_v29, 0.0  ;;  %v373_v29 = vpop.f32.mrf.mxu1 }
  0xc5   :  { %v2196_v32 = vmax.f32 %v512_v31, %v528_v30 }
  0xc7   :  { %v2199_v34 = vpop.f32.mrf.mxu2  ;;  %v2201_v35 = vpop.f32.mrf.mxu3 }
  0xc8   :  { %v337_v36 = vpop.f32.mrf.mxu0 }
  0xc9   :  { %v338_v38 = vadd.f32 %v2188_v24, %v337_v36  ;;  %v326_v36 = vadd.f32 %v2188_v24, %v2167_v16  ;;  %v329_v16 = vadd.f32 %v2188_v24, %v2177_v20 }
  0xcb   :  { %v513_v40 = vmax.f32 %v338_v38, 0.0  ;;  %v509_v46 = vmax.f32 %v326_v36, 0.0  ;;  %v458_v36 = vadd.f32 %v2188_v24, %v2175_v19 }
  0xcd   :  { %v2214_v41 = vmax.f32 %v513_v40, %v529_v39  ;;  %v374_v39 = vadd.f32 %v2188_v24, %v373_v29  ;;  %v376_v40 = vpop.f32.mrf.mxu1 }
  0xcf   :  { %v2221_v43 = vpop.f32.mrf.mxu2  ;;  %v2223_v44 = vpop.f32.mrf.mxu3 }
  0xd0   :  { %v340_v45 = vpop.f32.mrf.mxu0  ;;  %v470_v38 = vadd.f32 %v2188_v24, %v2223_v44 }
  0xd1   :  { %v341_v47 = vadd.f32 %v2188_v24, %v340_v45 }
  0xd3   :  { %v514_v49 = vmax.f32 %v341_v47, 0.0  ;;  %v557_v47 = vmax.f32 %v470_v38, 0.0 }
  0xd5   :  { %v2239_v50 = vmax.f32 %v514_v49, %v530_v48  ;;  %v525_v48 = vmax.f32 %v374_v39, 0.0  ;;  %v379_v20 = vpop.f32.mrf.mxu1 }
  0xd6   :  { %v380_v28 = vadd.f32 %v2188_v24, %v379_v20 }
  0xd7   :  { %v2246_v52 = vpop.f32.mrf.mxu2  ;;  %v2248_v53 = vpop.f32.mrf.mxu3  ;;  %v573_v54 = vmax.f32 %v509_v46, %v525_v48 }
  0xd8   :  { %v343_v55 = vpop.f32.mrf.mxu0  ;;  %v473_v44 = vadd.f32 %v2188_v24, %v2248_v53  ;;  %v332_v53 = vadd.f32 %v2188_v24, %v2183_v23  ;;  %v410_v38 = vadd.f32 %v2188_v24, %v2246_v52 }
  0xd9   :  { %v344_v57 = vadd.f32 %v2188_v24, %v343_v55  ;;  %v377_v55 = vadd.f32 %v2188_v24, %v376_v40  ;;  %v314_v40 = vadd.f32 %v2188_v24, %v2103_v56  ;;  %v553_v56 = vmax.f32 %v458_v36, 0.0 }
  0xdb   :  { %v515_v59 = vmax.f32 %v344_v57, 0.0  ;;  %v526_v6 = vmax.f32 %v377_v55, 0.0 }
  0xdd   :  { %v2264_v60 = vmax.f32 %v515_v59, %v531_v58 }
  0xdf   :  { %v2272_v0 = vpop.f32.mrf.mxu2  ;;  %v2274_v1 = vpop.f32.mrf.mxu3 }
  0xe0   :  { %v346_v2 = vpop.f32.mrf.mxu0  ;;  %v476_v25 = vadd.f32 %v2188_v24, %v2274_v1  ;;  %v511_v1 = vmax.f32 %v332_v53, 0.0  ;;  %v413_v20 = vadd.f32 %v2188_v24, %v2272_v0 }
  0xe1   :  { %v347_v5 = vadd.f32 %v2188_v24, %v346_v2  ;;  %v510_v2 = vmax.f32 %v329_v16, 0.0 }
  0xe2   :  { %v559_v48 = vmax.f32 %v476_v25, 0.0 }
  0xe3   :  { %v516_v8 = vmax.f32 %v347_v5, 0.0  ;;  %v558_v5 = vmax.f32 %v473_v44, 0.0  ;;  %v574_v12 = vmax.f32 %v510_v2, %v526_v6  ;;  %v505_v44 = vmax.f32 %v314_v40, 0.0 }
  0xe4   :  { %v461_v6 = vadd.f32 %v2188_v24, %v2181_v22 }
  0xe5   :  { %v2290_v13 = vmax.f32 %v516_v8, %v532_v7 }
  0xe7   :  { %v2298_v14 = vpop.f32.mrf.mxu2  ;;  %v2300_v17 = vpop.f32.mrf.mxu3 }
  0xe8   :  { %v2304_v18 = vpop.f32.mrf.mxu0  ;;  %v479_v2 = vadd.f32 %v2188_v24, %v2300_v17 }
  0xe9   :  { %v350_v55 = vadd.f32 %v2188_v24, %v2304_v18  ;;  %v446_v18 = vadd.f32 %v2188_v24, %v2117_v61 }
  0xea   :  { %v560_v36 = vmax.f32 %v479_v2, 0.0 }
  0xef   :  { %v2322_v30 = vpop.f32.mrf.mxu2  ;;  %v2324_v31 = vpop.f32.mrf.mxu3 }
  0xf0   :  { %v2328_v33 = vpop.f32.mrf.mxu0 }
  0xf7   :  { %v421_v42 = vpop.f32.mrf.mxu2  ;;  %v2335_v45 = vpop.f32.mrf.mxu3 }
  0xf8   :  { %v422_v49 = vadd.f32 %v2188_v24, %v421_v42  ;;  %v2338_v37 = vpop.f32.mrf.mxu0 }
  0xfa   :  { %v541_v51 = vmax.f32 %v422_v49, 0.0  ;;  %v527_v49 = vmax.f32 %v380_v28, 0.0 }
  0xfc   :  { %v589_v57 = vmax.f32 %v541_v51, %v557_v47  ;;  %v537_v51 = vmax.f32 %v410_v38, 0.0  ;;  %v554_v38 = vmax.f32 %v461_v6, 0.0 }
  0xfe   :  { %v605_v58 = vmax.f32 %v573_v54, %v589_v57 }
  0xff   :  { %v424_v59 = vpop.f32.mrf.mxu2  ;;  %v2345_v63 = vpop.f32.mrf.mxu3 }
 0x100   :  { %664 = vst.msk [vmem:[#allocation2 + $0x51] sm:$0xff] %vm617_vm2, %v605_v58  ;;  %v425_v7 = vadd.f32 %v2188_v24, %v424_v59  ;;  %v2349_v8 = vpop.f32.mrf.mxu0  ;;  %v398_v58 = vadd.f32 %v2188_v24, %v2179_v21  ;;  %v575_v59 = vmax.f32 %v511_v1, %v527_v49  ;;  %v317_v21 = vadd.f32 %v2188_v24, %v2119_v62 }
 0x102   :  { %v542_v11 = vmax.f32 %v425_v7, 0.0  ;;  %v585_v7 = vmax.f32 %v537_v51, %v553_v56  ;;  %v533_v62 = vmax.f32 %v398_v58, 0.0  ;;  %v506_v49 = vmax.f32 %v317_v21, 0.0 }
 0x103   :  { %v482_v56 = vadd.f32 %v2188_v24, %v2324_v31  ;;  %v353_v51 = vadd.f32 %v2188_v24, %v2328_v33  ;;  %v449_v58 = vadd.f32 %v2188_v24, %v2133_v3  ;;  %v320_v33 = vadd.f32 %v2188_v24, %v2135_v4 }
 0x104   :  { %v590_v29 = vmax.f32 %v542_v11, %v558_v5 }
 0x105   :  { %v550_v21 = vmax.f32 %v449_v58, 0.0 }
 0x106   :  { %v606_v39 = vmax.f32 %v574_v12, %v590_v29  ;;  %v517_v12 = vmax.f32 %v350_v55, 0.0  ;;  %v416_v55 = vadd.f32 %v2188_v24, %v2298_v14  ;;  %v518_v14 = vmax.f32 %v353_v51, 0.0 }
 0x107   :  { %v427_v42 = vpop.f32.mrf.mxu2  ;;  %v2362_v46 = vpop.f32.mrf.mxu3  ;;  %v2364_v23 = vld [vmem:[#allocation2 + $0x51] sm:$0xff] }
 0x108   :  { %v713_v47 = vld [vmem:[#allocation2 + $0x52] sm:$0xff]  ;;  %665 = vst.msk [vmem:[#allocation2 + $0x61] sm:$0xff] %vm617_vm2, %v606_v39  ;;  %v428_v19 = vadd.f32 %v2188_v24, %v427_v42  ;;  %1227 = vrot.lane.b32.xlu1 %v2364_v23, %s1839_s22  ;;  %v361_v52 = vpop.f32.mrf.mxu0  ;;  %847 = vrot.lane.b32.xlu2 %v2364_v23, %s1835_s0  ;;  %v538_v39 = vmax.f32 %v413_v20, 0.0  ;;  %v549_v42 = vmax.f32 %v446_v18, 0.0  ;;  %v561_v20 = vmax.f32 %v482_v56, 0.0 }
 0x109   :  { %911 = vrot.lane.b32.xlu0 %v713_v47, %s1836_s2  ;;  %v362_v16 = vadd.f32 %v2188_v24, %v361_v52  ;;  %v2388_v29 = vld [vmem:[#allocation2 + $0x50] sm:$0xff]  ;;  %v539_v18 = vmax.f32 %v416_v55, 0.0 }
 0x10a   :  { %v543_v54 = vmax.f32 %v428_v19, 0.0  ;;  %v581_v19 = vmax.f32 %v517_v12, %v533_v62  ;;  %v485_v62 = vadd.f32 %v2188_v24, %v2335_v45 }
 0x10b   :  { %v521_v57 = vmax.f32 %v362_v16, 0.0 }
 0x10c   :  { %v591_v5 = vmax.f32 %v543_v54, %v559_v48 }
 0x10d   :  { %v569_v11 = vmax.f32 %v505_v44, %v521_v57  ;;  %v464_v44 = vadd.f32 %v2188_v24, %v2193_v27 }
 0x10e   :  { %v607_v53 = vmax.f32 %v575_v59, %v591_v5  ;;  %v401_v59 = vadd.f32 %v2188_v24, %v2191_v26 }
 0x10f   :  { %v601_v25 = vmax.f32 %v569_v11, %v585_v7  ;;  %v430_v28 = vpop.f32.mrf.mxu2  ;;  %v493_v17 = vpop.f32.mrf.mxu3  ;;  %v2414_v7 = vld [vmem:[#allocation2 + $0x62] sm:$0xff] }
 0x110   :  { %666 = vst.msk [vmem:[#allocation2 + $0x71] sm:$0xff] %vm617_vm2, %v607_v53  ;;  %v431_v22 = vadd.f32 %v2188_v24, %v430_v28  ;;  %v494_v0 = vadd.f32 %v2188_v24, %v493_v17  ;;  %1101 = vrot.lane.b32.xlu1 %v713_v47, %s1840_s23  ;;  %v364_v61 = vpop.f32.mrf.mxu0  ;;  %1291 = vrot.lane.b32.xlu2 %v713_v47, %s1837_s20  ;;  %v2423_v4 = vld [vmem:[#allocation2 + $0x60] sm:$0xff]  ;;  %v534_v12 = vmax.f32 %v401_v59, 0.0  ;;  %v507_v17 = vmax.f32 %v320_v33, 0.0 }
 0x111   :  { %973 = vrot.lane.b32.xlu0 %v2388_v29, %s1841_s24  ;;  %660 = vst.msk [vmem:[#allocation2 + $0x11] sm:$0xff] %vm617_vm2, %v601_v25  ;;  %v365_v40 = vadd.f32 %v2188_v24, %v364_v61  ;;  %v586_v47 = vmax.f32 %v538_v39, %v554_v38 }
 0x112   :  { %v544_v1 = vmax.f32 %v431_v22, 0.0  ;;  %v565_v48 = vmax.f32 %v494_v0, 0.0  ;;  %v356_v22 = vadd.f32 %v2188_v24, %v2338_v37  ;;  %v582_v61 = vmax.f32 %v518_v14, %v534_v12 }
 0x113   :  { %v522_v52 = vmax.f32 %v365_v40, 0.0  ;;  %v467_v40 = vadd.f32 %v2188_v24, %v2201_v35  ;;  %v407_v14 = vadd.f32 %v2188_v24, %v2221_v43 }
 0x114   :  { %v592_v16 = vmax.f32 %v544_v1, %v560_v36  ;;  %v597_v54 = vmax.f32 %v549_v42, %v565_v48  ;;  %v404_v36 = vadd.f32 %v2188_v24, %v2199_v34  ;;  %v419_v1 = vadd.f32 %v2188_v24, %v2322_v30 }
 0x115   :  { %v570_v57 = vmax.f32 %v506_v49, %v522_v52  ;;  %v452_v34 = vadd.f32 %v2188_v24, %v2149_v9  ;;  %v519_v45 = vmax.f32 %v356_v22, 0.0 }
 0x116   :  { %v608_v31 = vmax.f32 %v2196_v32, %v592_v16  ;;  %v613_v2 = vmax.f32 %v581_v19, %v597_v54  ;;  %v555_v32 = vmax.f32 %v464_v44, 0.0  ;;  %v323_v19 = vadd.f32 %v2188_v24, %v2151_v10 }
 0x117   :  { %v602_v5 = vmax.f32 %v570_v57, %v586_v47  ;;  %v433_v6 = vpop.f32.mrf.mxu2  ;;  %v496_v27 = vpop.f32.mrf.mxu3  ;;  %v562_v16 = vmax.f32 %v485_v62, 0.0  ;;  %v535_v10 = vmax.f32 %v404_v36, 0.0  ;;  %v540_v54 = vmax.f32 %v419_v1, 0.0 }
 0x118   :  { %667 = vst.msk [vmem:[#allocation2 + $0x81] sm:$0xff] %vm617_vm2, %v608_v31  ;;  %v434_v3 = vadd.f32 %v2188_v24, %v433_v6  ;;  %v497_v11 = vadd.f32 %v2188_v24, %v496_v27  ;;  %913 = vrot.lane.b32.xlu1 %v2414_v7, %s1836_s2  ;;  %v367_v26 = vpop.f32.mrf.mxu0  ;;  %1165 = vrot.lane.b32.xlu2 %v2423_v4, %s1838_s21  ;;  %v551_v47 = vmax.f32 %v452_v34, 0.0  ;;  %v508_v58 = vmax.f32 %v323_v19, 0.0  ;;  %v740_v34 = vld [vmem:[#allocation2 + $0x11] sm:$0xff]  ;;  %v902_v19 = vpop.permute.xlu1 %901 }
 0x119   :  { %1163 = vrot.lane.b32.xlu0 %v2388_v29, %s1838_s21  ;;  %672 = vst.msk [vmem:[#allocation2 + $0xf1] sm:$0xff] %vm617_vm2, %v613_v2  ;;  %v368_v53 = vadd.f32 %v2188_v24, %v367_v26  ;;  %v587_v42 = vmax.f32 %v539_v18, %v555_v32  ;;  %v583_v59 = vmax.f32 %v519_v45, %v535_v10 }
 0x11a   :  { %661 = vst.msk [vmem:[#allocation2 + $0x21] sm:$0xff] %vm617_vm2, %v602_v5  ;;  %v545_v25 = vmax.f32 %v434_v3, 0.0  ;;  %v566_v28 = vmax.f32 %v497_v11, 0.0  ;;  %v359_v2 = vadd.f32 %v2188_v24, %v2349_v8  ;;  %v491_v36 = vadd.f32 %v2188_v24, %v2362_v46 }
 0x11b   :  { %v523_v0 = vmax.f32 %v368_v53, 0.0 }
 0x11c   :  { %v593_v38 = vmax.f32 %v545_v25, %v561_v20  ;;  %v598_v39 = vmax.f32 %v550_v21, %v566_v28  ;;  %v455_v20 = vadd.f32 %v2188_v24, %v2165_v15  ;;  %v520_v21 = vmax.f32 %v359_v2, 0.0  ;;  %v715_v15 = vld [vmem:[#allocation2 + $0x72] sm:$0xff] }
 0x11d   :  { %v571_v48 = vmax.f32 %v507_v17, %v523_v0 }
 0x11e   :  { %v609_v37 = vmax.f32 %v2214_v41, %v593_v38  ;;  %v614_v49 = vmax.f32 %v582_v61, %v598_v39  ;;  %v556_v41 = vmax.f32 %v467_v40, 0.0  ;;  %v552_v43 = vmax.f32 %v455_v20, 0.0  ;;  %v699_v38 = vld [vmem:[#allocation2 + $0x71] sm:$0xff] }
 0x11f   :  { %v603_v52 = vmax.f32 %v571_v48, %v587_v42  ;;  %v436_v56 = vpop.f32.mrf.mxu2  ;;  %v499_v51 = vpop.f32.mrf.mxu3  ;;  %v564_v39 = vmax.f32 %v491_v36, 0.0  ;;  %v2482_v42 = vld [vmem:[#allocation2 + $0x70] sm:$0xff]  ;;  %v676_v48 = vld [vmem:[#allocation2] sm:$0xff] }
 0x120   :  { %668 = vst.msk [vmem:[#allocation2 + $0xb1] sm:$0xff] %vm617_vm2, %v609_v37  ;;  %v437_v35 = vadd.f32 %v2188_v24, %v436_v56  ;;  %v500_v30 = vadd.f32 %v2188_v24, %v499_v51  ;;  %1293 = vrot.lane.b32.xlu1 %v2414_v7, %s1837_s20  ;;  %v370_v9 = vpop.f32.mrf.mxu0  ;;  %975 = vrot.lane.b32.xlu2 %v2423_v4, %s1841_s24  ;;  %v838_v37 = vpop.permute.xlu0 %837  ;;  %v684_v51 = vld [vmem:[#allocation2 + $0xa0] sm:$0xff]  ;;  %v2514_v10 = vld [vmem:[#allocation2 + $0xf2] sm:$0xff] }
 0x121   :  { %1037 = vrot.lane.b32.xlu0 %v2364_v23, %s1842_s25  ;;  %673 = vst.msk [vmem:[#allocation2 + $0x101] sm:$0xff] %vm617_vm2, %v614_v49  ;;  %v371_v44 = vadd.f32 %v2188_v24, %v370_v9  ;;  %v488_v23 = vadd.f32 %v2188_v24, %v2345_v63  ;;  %v588_v6 = vmax.f32 %v540_v54, %v556_v41  ;;  %v698_v63 = vld [vmem:[#allocation2 + $0x61] sm:$0xff]  ;;  %v854_v56 = vpop.permute.xlu2 %853 }
 0x122   :  { %662 = vst.msk [vmem:[#allocation2 + $0x31] sm:$0xff] %vm617_vm2, %v603_v52  ;;  %v546_v55 = vmax.f32 %v437_v35, 0.0  ;;  %v567_v57 = vmax.f32 %v500_v30, 0.0  ;;  %v1333_v49 = vsel %vm617_vm2, %v676_v48, %v838_v37  ;;  %v2506_v52 = vld [vmem:[#allocation2 + $0xf1] sm:$0xff]  ;;  %v811_v35 = vld [vmem:[#allocation2 + $0x82] sm:$0xff] }
 0x123   :  { %v524_v31 = vmax.f32 %v371_v44, 0.0  ;;  %v563_v53 = vmax.f32 %v488_v23, 0.0  ;;  %v2504_v45 = vsel %vm1349_vm4, %v1333_v49, %v902_v19  ;;  %v795_v30 = vld [vmem:[#allocation2 + $0x81] sm:$0xff] }
 0x124   :  { %v594_v33 = vmax.f32 %v546_v55, %v562_v16  ;;  %v599_v5 = vmax.f32 %v551_v47, %v567_v57  ;;  %v1341_v16 = vsel %vm617_vm2, %v684_v51, %v854_v56  ;;  %v779_v44 = vld [vmem:[#allocation2 + $0x80] sm:$0xff] }
 0x125   :  { %v572_v27 = vmax.f32 %v508_v58, %v524_v31  ;;  %v694_v57 = vld [vmem:[#allocation2 + $0x21] sm:$0xff]  ;;  %v2538_v31 = vpop.permute.xlu1 %1299 }
 0x126   :  { %v610_v3 = vmax.f32 %v2239_v50, %v594_v33  ;;  %v615_v11 = vmax.f32 %v583_v59, %v599_v5  ;;  %v536_v50 = vmax.f32 %v407_v14, 0.0  ;;  %v710_v58 = vld [vmem:[#allocation2 + $0x22] sm:$0xff]  ;;  %v2535_v59 = vld [vmem:[#allocation2 + $0xf0] sm:$0xff] }
 0x127   :  { %v604_v26 = vmax.f32 %v572_v27, %v588_v6  ;;  %v439_v32 = vpop.f32.mrf.mxu2  ;;  %v502_v18 = vpop.f32.mrf.mxu3  ;;  %v2546_v33 = vld [vmem:[#allocation2 + $0x20] sm:$0xff] }
 0x128   :  { %669 = vst.msk [vmem:[#allocation2 + $0xc1] sm:$0xff] %vm617_vm2, %v610_v3  ;;  %v440_v8 = vadd.f32 %v2188_v24, %v439_v32  ;;  %v503_v12 = vadd.f32 %v2188_v24, %v502_v18  ;;  %1103 = vrot.lane.b32.xlu1 %v2414_v7, %s1840_s23  ;;  %915 = vrot.lane.b32.xlu2 %v715_v15, %s1836_s2  ;;  %v918_v9 = vpop.permute.xlu0 %917  ;;  %v717_v18 = vld [vmem:[#allocation2 + $0xb2] sm:$0xff] }
 0x129   :  { %849 = vrot.lane.b32.xlu0 %v698_v63, %s1835_s0  ;;  %674 = vst.msk [vmem:[#allocation2 + $0x111] sm:$0xff] %vm617_vm2, %v615_v11  ;;  %v584_v17 = vmax.f32 %v520_v21, %v536_v50  ;;  %v2518_v41 = vsel %vm1349_vm4, %v1341_v16, %v918_v9  ;;  %v2522_v54 = vpop.permute.xlu2 %1171  ;;  %v2559_v11 = vld [vmem:[#allocation2 + $0x101] sm:$0xff] }
 0x12a   :  { %663 = vst.msk [vmem:[#allocation2 + $0x41] sm:$0xff] %vm617_vm2, %v604_v26  ;;  %v547_v25 = vmax.f32 %v440_v8, 0.0  ;;  %v568_v28 = vmax.f32 %v503_v12, 0.0  ;;  %v701_v12 = vld [vmem:[#allocation2 + $0xb1] sm:$0xff] }
 0x12c   :  { %v595_v22 = vmax.f32 %v547_v25, %v563_v53  ;;  %v600_v0 = vmax.f32 %v552_v43, %v568_v28  ;;  %v695_v28 = vld [vmem:[#allocation2 + $0x31] sm:$0xff] }
 0x12e   :  { %v611_v7 = vmax.f32 %v2264_v60, %v595_v22  ;;  %v616_v61 = vmax.f32 %v584_v17, %v600_v0  ;;  %v2587_v17 = vld [vmem:[#allocation2 + $0x102] sm:$0xff] }
 0x12f   :  { %v442_v62 = vpop.f32.mrf.mxu2  ;;  %v702_v9 = vld [vmem:[#allocation2 + $0xc1] sm:$0xff] }
 0x130   :  { %670 = vst.msk [vmem:[#allocation2 + $0xd1] sm:$0xff] %vm617_vm2, %v611_v7  ;;  %v443_v40 = vadd.f32 %v2188_v24, %v442_v62  ;;  %851 = vrot.lane.b32.xlu1 %v699_v38, %s1835_s0  ;;  %1167 = vrot.lane.b32.xlu2 %v2482_v42, %s1838_s21  ;;  %v709_v24 = vld [vmem:[#allocation2 + $0x12] sm:$0xff] }
 0x131   :  { %1229 = vrot.lane.b32.xlu0 %v698_v63, %s1839_s22  ;;  %675 = vst.msk [vmem:[#allocation2 + $0x121] sm:$0xff] %vm617_vm2, %v616_v61 }
 0x132   :  { %v548_v60 = vmax.f32 %v443_v40, 0.0 }
 0x134   :  { %v596_v46 = vmax.f32 %v548_v60, %v564_v39  ;;  %v2540_v23 = vpop.permute.xlu0 %1235  ;;  %v2600_v39 = vld [vmem:[#allocation2 + $0xc2] sm:$0xff] }
 0x136   :  { %v612_v1 = vmax.f32 %v2290_v13, %v596_v46  ;;  %v2498_v13 = vld [vmem:[#allocation2 + $0x10] sm:$0xff] }
 0x138   :  { %671 = vst.msk [vmem:[#allocation2 + $0xe1] sm:$0xff] %vm617_vm2, %v612_v1  ;;  %1295 = vrot.lane.b32.xlu1 %v715_v15, %s1837_s20  ;;  %977 = vrot.lane.b32.xlu2 %v2482_v42, %s1841_s24 }
 0x139   :  { %1039 = vrot.lane.b32.xlu0 %v698_v63, %s1842_s25  ;;  %v2570_v63 = vld [vmem:[#allocation2 + $0xb0] sm:$0xff] }
 0x140   :  { %1105 = vrot.lane.b32.xlu1 %v715_v15, %s1840_s23  ;;  %903 = vrot.lane.b32.xlu2 %v709_v24, %s1836_s2  ;;  %v2578_v15 = vld [vmem:[#allocation2 + $0x30] sm:$0xff] }
 0x141   :  { %1231 = vrot.lane.b32.xlu0 %v699_v38, %s1839_s22 }
 0x148   :  { %1029 = vrot.lane.b32.xlu1 %v740_v34, %s1842_s25  ;;  %965 = vrot.lane.b32.xlu2 %v2498_v13, %s1841_s24 }
 0x149   :  { %1041 = vrot.lane.b32.xlu0 %v699_v38, %s1842_s25  ;;  %v711_v38 = vld [vmem:[#allocation2 + $0x32] sm:$0xff] }
 0x150   :  { %863 = vrot.lane.b32.xlu1 %v2506_v52, %s1835_s0  ;;  %1093 = vrot.lane.b32.xlu2 %v709_v24, %s1840_s23  ;;  %v2614_v24 = vld [vmem:[#allocation2 + $0xc0] sm:$0xff] }
 0x151   :  { %839 = vrot.lane.b32.xlu0 %v740_v34, %s1835_s0 }
 0x158   :  { %1297 = vrot.lane.b32.xlu1 %v811_v35, %s1837_s20  ;;  %927 = vrot.lane.b32.xlu2 %v2514_v10, %s1836_s2 }
 0x159   :  { %1233 = vrot.lane.b32.xlu0 %v795_v30, %s1839_s22 }
 0x160   :  { %1107 = vrot.lane.b32.xlu1 %v811_v35, %s1840_s23  ;;  %1169 = vrot.lane.b32.xlu2 %v779_v44, %s1838_s21 }
 0x161   :  { %1043 = vrot.lane.b32.xlu0 %v795_v30, %s1842_s25 }
 0x162   :  { %v848_v47 = vpop.permute.xlu2 %847 }
 0x163   :  { %v1338_v5 = vsel %vm617_vm2, %v2388_v29, %v848_v47  ;;  %v2635_v47 = vld [vmem:[#allocation2 + $0x41] sm:$0xff] }
 0x168   :  { %1307 = vrot.lane.b32.xlu1 %v2514_v10, %s1837_s20  ;;  %979 = vrot.lane.b32.xlu2 %v779_v44, %s1841_s24  ;;  %v2632_v44 = vld [vmem:[#allocation2 + $0x111] sm:$0xff] }
 0x169   :  { %1243 = vrot.lane.b32.xlu0 %v2506_v52, %s1839_s22 }
 0x16a   :  { %v2532_v55 = vpop.permute.xlu2 %1291 }
 0x170   :  { %841 = vrot.lane.b32.xlu1 %v694_v57, %s1835_s0  ;;  %1179 = vrot.lane.b32.xlu2 %v2535_v59, %s1838_s21 }
 0x171   :  { %905 = vrot.lane.b32.xlu0 %v710_v58, %s1836_s2 }
 0x172   :  { %v2544_v2 = vpop.permute.xlu2 %1165 }
 0x178   :  { %1221 = vrot.lane.b32.xlu1 %v694_v57, %s1839_s22  ;;  %1285 = vrot.lane.b32.xlu2 %v710_v58, %s1837_s20 }
 0x179   :  { %967 = vrot.lane.b32.xlu0 %v2546_v33, %s1841_s24 }
 0x17a   :  { %v2554_v6 = vpop.permute.xlu1 %1227  ;;  %v976_v14 = vpop.permute.xlu2 %975 }
 0x17b   :  { %v912_v27 = vpop.permute.xlu0 %911 }
 0x17c   :  { %v1355_v20 = vsel %vm1349_vm4, %v1338_v5, %v912_v27 }
 0x17d   :  { %v1372_v3 = vsel %vm1366_vm5, %v1355_v20, %v976_v14 }
 0x180   :  { %1095 = vrot.lane.b32.xlu1 %v710_v58, %s1840_s23  ;;  %865 = vrot.lane.b32.xlu2 %v2559_v11, %s1835_s0 }
 0x181   :  { %1157 = vrot.lane.b32.xlu0 %v2546_v33, %s1838_s21 }
 0x182   :  { %v2565_v26 = vpop.permute.xlu1 %1101  ;;  %v916_v32 = vpop.permute.xlu2 %915 }
 0x183   :  { %v2567_v29 = vpop.permute.xlu0 %973 }
 0x188   :  { %919 = vrot.lane.b32.xlu1 %v717_v18, %s1836_s2  ;;  %981 = vrot.lane.b32.xlu2 %v2570_v63, %s1841_s24 }
 0x189   :  { %1031 = vrot.lane.b32.xlu0 %v694_v57, %s1842_s25 }
 0x18a   :  { %v914_v53 = vpop.permute.xlu1 %913  ;;  %v1168_v8 = vpop.permute.xlu2 %1167 }
 0x18b   :  { %v2575_v21 = vpop.permute.xlu0 %1163 }
 0x190   :  { %1109 = vrot.lane.b32.xlu1 %v717_v18, %s1840_s23  ;;  %1159 = vrot.lane.b32.xlu2 %v2578_v15, %s1838_s21 }
 0x191   :  { %855 = vrot.lane.b32.xlu0 %v701_v12, %s1835_s0 }
 0x192   :  { %v2583_v43 = vpop.permute.xlu1 %1293  ;;  %v978_v25 = vpop.permute.xlu2 %977 }
 0x193   :  { %v2585_v50 = vpop.permute.xlu0 %1037 }
 0x198   :  { %843 = vrot.lane.b32.xlu1 %v695_v28, %s1835_s0  ;;  %1033 = vrot.lane.b32.xlu2 %v695_v28, %s1842_s25 }
 0x199   :  { %929 = vrot.lane.b32.xlu0 %v2587_v17, %s1836_s2 }
 0x19a   :  { %v1104_v36 = vpop.permute.xlu1 %1103  ;;  %v2595_v7 = vpop.permute.xlu2 %903 }
 0x19b   :  { %v850_v22 = vpop.permute.xlu0 %849 }
 0x19c   :  { %v1339_v0 = vsel %vm617_vm2, %v2423_v4, %v850_v22  ;;  %v1475_v22 = vld [vmem:[%s3003_s3 + $0x38] sm:$0xff] }
 0x19d   :  { %v1356_v61 = vsel %vm1349_vm4, %v1339_v0, %v914_v53 }
 0x19e   :  { %v1373_v62 = vsel %vm1366_vm5, %v1356_v61, %v978_v25 }
 0x1a0   :  { %907 = vrot.lane.b32.xlu1 %v711_v38, %s1836_s2  ;;  %921 = vrot.lane.b32.xlu2 %v2600_v39, %s1836_s2 }
 0x1a1   :  { %1045 = vrot.lane.b32.xlu0 %v701_v12, %s1842_s25 }
 0x1a2   :  { %v852_v40 = vpop.permute.xlu1 %851  ;;  %v2609_v46 = vpop.permute.xlu2 %965 }
 0x1a3   :  { %v2605_v60 = vpop.permute.xlu0 %1229  ;;  %v1340_v4 = vsel %vm617_vm2, %v2482_v42, %v852_v40 }
 0x1a4   :  { %v1357_v1 = vsel %vm1349_vm4, %v1340_v4, %v916_v32  ;;  %v712_v32 = vld [vmem:[#allocation2 + $0x42] sm:$0xff] }
 0x1a8   :  { %969 = vrot.lane.b32.xlu1 %v2578_v15, %s1841_s24  ;;  %1173 = vrot.lane.b32.xlu2 %v2614_v24, %s1838_s21 }
 0x1a9   :  { %1223 = vrot.lane.b32.xlu0 %v695_v28, %s1839_s22 }
 0x1aa   :  { %v1296_v48 = vpop.permute.xlu1 %1295  ;;  %v2620_v37 = vpop.permute.xlu2 %1093 }
 0x1ab   :  { %v1040_v34 = vpop.permute.xlu0 %1039 }
 0x1ac   :  { %v1389_v42 = vsel %vm1383_vm6, %v1372_v3, %v1040_v34  ;;  %v2646_v3 = vld [vmem:[#allocation2 + $0x112] sm:$0xff] }
 0x1ad   :  { %v1406_v49 = vsel %vm1400_vm7, %v1389_v42, %v1104_v36  ;;  %v1476_v36 = vld [vmem:[%s3003_s3 + $0x40] sm:$0xff]  ;;  %v1471_v42 = vld [vmem:[%s3003_s3 + $0x18] sm:$0xff] }
 0x1ae   :  { %v1423_v19 = vsel %vm1417_vm8, %v1406_v49, %v1168_v8  ;;  %1533 = vmatpush.msrb.mxu1 %v1476_v36  ;;  %v1470_v49 = vld [vmem:[%s3003_s3 + $0x10] sm:$0xff] }
 0x1b0   :  { %1287 = vrot.lane.b32.xlu1 %v711_v38, %s1837_s20  ;;  %983 = vrot.lane.b32.xlu2 %v2614_v24, %s1841_s24 }
 0x1b1   :  { %1097 = vrot.lane.b32.xlu0 %v711_v38, %s1840_s23  ;;  %1534 = vmatpush.msrb.mxu1 %v1475_v22 }
 0x1b2   :  { %v1106_v56 = vpop.permute.xlu1 %1105  ;;  %v928_v35 = vpop.permute.xlu2 %927 }
 0x1b3   :  { %v1232_v51 = vpop.permute.xlu0 %1231 }
 0x1b4   :  { %v1440_v16 = vsel %vm1434_vm9, %v1423_v19, %v1232_v51 }
 0x1b5   :  { %v2630_v30 = vsel %vm1451_vm10, %v1440_v16, %v1296_v48  ;;  %v1472_v48 = vld [vmem:[%s3003_s3 + $0x20] sm:$0xff] }
 0x1b8   :  { %857 = vrot.lane.b32.xlu1 %v702_v9, %s1835_s0  ;;  %845 = vrot.lane.b32.xlu2 %v2635_v47, %s1835_s0 }
 0x1b9   :  { %867 = vrot.lane.b32.xlu0 %v2632_v44, %s1835_s0 }
 0x1ba   :  { %v2641_v58 = vpop.permute.xlu1 %1029  ;;  %v1170_v27 = vpop.permute.xlu2 %1169 }
 0x1bb   :  { %v1042_v57 = vpop.permute.xlu0 %1041 }
 0x1bc   :  { %v1390_v5 = vsel %vm1383_vm6, %v1373_v62, %v1042_v57 }
 0x1bd   :  { %v1407_v20 = vsel %vm1400_vm7, %v1390_v5, %v1106_v56 }
 0x1be   :  { %v1424_v14 = vsel %vm1417_vm8, %v1407_v20, %v1170_v27  ;;  %v690_v27 = vld [vmem:[#allocation2 + $0x100] sm:$0xff] }
 0x1c0   :  { %931 = vrot.lane.b32.xlu1 %v2646_v3, %s1836_s2  ;;  %909 = vrot.lane.b32.xlu2 %v712_v32, %s1836_s2 }
 0x1c1   :  { %1237 = vrot.lane.b32.xlu0 %v702_v9, %s1839_s22 }
 0x1c2   :  { %v864_v18 = vpop.permute.xlu1 %863  ;;  %v980_v12 = vpop.permute.xlu2 %979 }
 0x1c3   :  { %v840_v53 = vpop.permute.xlu0 %839  ;;  %v1346_v8 = vsel %vm617_vm2, %v2535_v59, %v864_v18  ;;  %v1374_v28 = vsel %vm1366_vm5, %v1357_v1, %v980_v12  ;;  %v1473_v1 = vld [vmem:[%s3003_s3 + $0x28] sm:$0xff] }
 0x1c4   :  { %v1334_v25 = vsel %vm617_vm2, %v2498_v13, %v840_v53  ;;  %v2668_v61 = vsel %vm1349_vm4, %v1346_v8, %v928_v35  ;;  %v2672_v13 = vld [vmem:[#allocation2 + $0x40] sm:$0xff] }
 0x1c5   :  { %v2665_v0 = vsel %vm1349_vm4, %v1334_v25, %v2595_v7  ;;  %v1474_v7 = vld [vmem:[%s3003_s3 + $0x30] sm:$0xff] }
 0x1c6   :  { %1535 = vmatpush.msrb.mxu1 %v1474_v7  ;;  %v703_v7 = vld [vmem:[#allocation2 + $0xd1] sm:$0xff] }
 0x1c8   :  { %1301 = vrot.lane.b32.xlu1 %v2600_v39, %s1837_s20  ;;  %971 = vrot.lane.b32.xlu2 %v2672_v13, %s1841_s24 }
 0x1c9   :  { %1047 = vrot.lane.b32.xlu0 %v702_v9, %s1842_s25  ;;  %1536 = vmatpush.msrb.mxu1 %v1473_v1  ;;  %v1468_v9 = vld [vmem:[%s3003_s3] sm:$0xff] }
 0x1ca   :  { %v1298_v62 = vpop.permute.xlu1 %1297  ;;  %v2680_v40 = vpop.permute.xlu2 %1179 }
 0x1cb   :  { %v1234_v38 = vpop.permute.xlu0 %1233  ;;  %1537 = vmatpush.msrb.mxu1 %v1472_v48 }
 0x1cc   :  { %v1441_v4 = vsel %vm1434_vm9, %v1424_v14, %v1234_v38 }
 0x1cd   :  { %v2690_v34 = vsel %vm1451_vm10, %v1441_v4, %v1298_v62  ;;  %1538 = vmatpush.msrb.mxu1 %v1471_v42  ;;  %v2765_v4 = vld [vmem:[#allocation2 + $0xd0] sm:$0xff] }
 0x1cf   :  { %1539 = vmatpush.msrb.mxu1 %v1470_v49 }
 0x1d0   :  { %1111 = vrot.lane.b32.xlu1 %v2600_v39, %s1840_s23  ;;  %1225 = vrot.lane.b32.xlu2 %v2635_v47, %s1839_s22  ;;  %v1469_v39 = vld [vmem:[%s3003_s3 + $0x8] sm:$0xff] }
 0x1d1   :  { %1289 = vrot.lane.b32.xlu0 %v712_v32, %s1837_s20  ;;  %1540 = vmatpush.msrb.mxu1 %v1469_v39 }
 0x1d2   :  { %v1108_v19 = vpop.permute.xlu1 %1107  ;;  %v1286_v51 = vpop.permute.xlu2 %1285 }
 0x1d3   :  { %v1044_v56 = vpop.permute.xlu0 %1043  ;;  %1541 = vmatpush.msrb.mxu1 %v1468_v9 }
 0x1d4   :  { %v1391_v16 = vsel %vm1383_vm6, %v1374_v28, %v1044_v56  ;;  %v719_v28 = vld [vmem:[#allocation2 + $0xd2] sm:$0xff] }
 0x1d5   :  { %v2708_v35 = vsel %vm1400_vm7, %v1391_v16, %v1108_v19  ;;  %v704_v19 = vld [vmem:[#allocation2 + $0xe1] sm:$0xff] }
 0x1d8   :  { %1161 = vrot.lane.b32.xlu1 %v2672_v13, %s1838_s21  ;;  %1099 = vrot.lane.b32.xlu2 %v712_v32, %s1840_s23 }
 0x1d9   :  { %1053 = vrot.lane.b32.xlu0 %v2506_v52, %s1842_s25 }
 0x1da   :  { %v2718_v57 = vpop.permute.xlu1 %1307  ;;  %v866_v20 = vpop.permute.xlu2 %865 }
 0x1db   :  { %v2720_v5 = vpop.permute.xlu0 %1243  ;;  %v1347_v14 = vsel %vm617_vm2, %v690_v27, %v866_v20 }
 0x1e0   :  { %1035 = vrot.lane.b32.xlu1 %v2635_v47, %s1842_s25  ;;  %989 = vrot.lane.b32.xlu2 %v2535_v59, %s1841_s24 }
 0x1e1   :  { %1245 = vrot.lane.b32.xlu0 %v2559_v11, %s1839_s22 }
 0x1e2   :  { %v842_v52 = vpop.permute.xlu1 %841  ;;  %v982_v53 = vpop.permute.xlu2 %981 }
 0x1e3   :  { %v906_v18 = vpop.permute.xlu0 %905  ;;  %v1335_v32 = vsel %vm617_vm2, %v2546_v33, %v842_v52  ;;  %v1375_v8 = vsel %vm1366_vm5, %v2518_v41, %v982_v53  ;;  %v1367_v33 = vsel %vm1366_vm5, %v2504_v45, %v2609_v46 }
 0x1e4   :  { %v2734_v12 = vsel %vm1349_vm4, %v1335_v32, %v906_v18  ;;  %v1384_v41 = vsel %vm1383_vm6, %v1367_v33, %v2641_v58 }
 0x1e8   :  { %1117 = vrot.lane.b32.xlu1 %v2514_v10, %s1840_s23  ;;  %1181 = vrot.lane.b32.xlu2 %v690_v27, %s1838_s21 }
 0x1e9   :  { %1055 = vrot.lane.b32.xlu0 %v2559_v11, %s1842_s25  ;;  %v1401_v11 = vsel %vm1400_vm7, %v1384_v41, %v2620_v37 }
 0x1ea   :  { %v1222_v59 = vpop.permute.xlu1 %1221  ;;  %v2741_v25 = vpop.permute.xlu2 %1159 }
 0x1eb   :  { %v968_v47 = vpop.permute.xlu0 %967 }
 0x1f0   :  { %1309 = vrot.lane.b32.xlu1 %v2587_v17, %s1837_s20  ;;  %991 = vrot.lane.b32.xlu2 %v690_v27, %s1841_s24  ;;  %v2786_v27 = vld [vmem:[#allocation2 + $0xe0] sm:$0xff] }
 0x1f1   :  { %923 = vrot.lane.b32.xlu0 %v719_v28, %s1836_s2 }
 0x1f2   :  { %v1096_v10 = vpop.permute.xlu1 %1095  ;;  %v2754_v22 = vpop.permute.xlu2 %1033 }
 0x1f3   :  { %v1158_v36 = vpop.permute.xlu0 %1157 }
 0x1f4   :  { %v1418_v45 = vsel %vm1417_vm8, %v1401_v11, %v1158_v36  ;;  %v786_v36 = vld [vmem:[#allocation2 + $0x110] sm:$0xff] }
 0x1f5   :  { %v1435_v46 = vsel %vm1434_vm9, %v1418_v45, %v1222_v59  ;;  %v1368_v59 = vsel %vm1366_vm5, %v2665_v0, %v968_v47 }
 0x1f6   :  { %v1452_v58 = vsel %vm1451_vm10, %v1435_v46, %v1286_v51 }
 0x1f7   :  { %1786 = vmatmul.msk.f32.vlgmr.msrb.gmra.mxu1 %vm1477_vm11, %v1452_v58 }
 0x1f8   :  { %1119 = vrot.lane.b32.xlu1 %v2587_v17, %s1840_s23  ;;  %859 = vrot.lane.b32.xlu2 %v703_v7, %s1835_s0 }
 0x1f9   :  { %1239 = vrot.lane.b32.xlu0 %v703_v7, %s1839_s22 }
 0x1fa   :  { %v920_v37 = vpop.permute.xlu1 %919  ;;  %v922_v38 = vpop.permute.xlu2 %921 }
 0x1fb   :  { %v1032_v62 = vpop.permute.xlu0 %1031 }
 0x200   :  { %1303 = vrot.lane.b32.xlu1 %v719_v28, %s1837_s20  ;;  %1175 = vrot.lane.b32.xlu2 %v2765_v4, %s1838_s21 }
 0x201   :  { %1049 = vrot.lane.b32.xlu0 %v703_v7, %s1842_s25 }
 0x202   :  { %v1110_v1 = vpop.permute.xlu1 %1109  ;;  %v1174_v42 = vpop.permute.xlu2 %1173 }
 0x203   :  { %v856_v48 = vpop.permute.xlu0 %855 }
 0x204   :  { %v1342_v17 = vsel %vm617_vm2, %v2570_v63, %v856_v48  ;;  %v720_v63 = vld [vmem:[#allocation2 + $0xe2] sm:$0xff] }
 0x205   :  { %v1359_v49 = vsel %vm1349_vm4, %v1342_v17, %v920_v37  ;;  %v787_v17 = vld [vmem:[#allocation2 + $0x120] sm:$0xff] }
 0x208   :  { %1113 = vrot.lane.b32.xlu1 %v719_v28, %s1840_s23  ;;  %985 = vrot.lane.b32.xlu2 %v2765_v4, %s1841_s24  ;;  %v1385_v28 = vsel %vm1383_vm6, %v1368_v59, %v1032_v62 }
 0x209   :  { %861 = vrot.lane.b32.xlu0 %v704_v19, %s1835_s0 }
 0x20a   :  { %v2777_v56 = vpop.permute.xlu1 %843  ;;  %v984_v16 = vpop.permute.xlu2 %983 }
 0x20b   :  { %v930_v51 = vpop.permute.xlu0 %929  ;;  %v2783_v9 = vsel %vm1366_vm5, %v1359_v49, %v984_v16 }
 0x20c   :  { %v2780_v39 = vsel %vm1349_vm4, %v1347_v14, %v930_v51 }
 0x210   :  { %925 = vrot.lane.b32.xlu1 %v720_v63, %s1836_s2  ;;  %1177 = vrot.lane.b32.xlu2 %v2786_v27, %s1838_s21 }
 0x211   :  { %1241 = vrot.lane.b32.xlu0 %v704_v19, %s1839_s22 }
 0x212   :  { %v2791_v20 = vpop.permute.xlu1 %907  ;;  %v2793_v18 = vpop.permute.xlu2 %845 }
 0x213   :  { %v1046_v52 = vpop.permute.xlu0 %1045 }
 0x214   :  { %v1392_v14 = vsel %vm1383_vm6, %v1375_v8, %v1046_v52  ;;  %v1402_v8 = vsel %vm1400_vm7, %v1385_v28, %v1096_v10  ;;  %v804_v52 = vld [vmem:[#allocation2 + $0x131] sm:$0xff] }
 0x215   :  { %v1409_v32 = vsel %vm1400_vm7, %v1392_v14, %v1110_v1  ;;  %v1419_v45 = vsel %vm1417_vm8, %v1402_v8, %v2741_v25  ;;  %v788_v14 = vld [vmem:[#allocation2 + $0x130] sm:$0xff] }
 0x216   :  { %v1426_v53 = vsel %vm1417_vm8, %v1409_v32, %v1174_v42  ;;  %v803_v42 = vld [vmem:[#allocation2 + $0x121] sm:$0xff]  ;;  %v820_v8 = vld [vmem:[#allocation2 + $0x132] sm:$0xff] }
 0x218   :  { %1305 = vrot.lane.b32.xlu1 %v720_v63, %s1837_s20  ;;  %987 = vrot.lane.b32.xlu2 %v2786_v27, %s1841_s24 }
 0x219   :  { %1051 = vrot.lane.b32.xlu0 %v704_v19, %s1842_s25 }
 0x21a   :  { %v970_v33 = vpop.permute.xlu1 %969  ;;  %v910_v11 = vpop.permute.xlu2 %909 }
 0x21b   :  { %v1224_v41 = vpop.permute.xlu0 %1223 }
 0x21c   :  { %v1436_v0 = vsel %vm1434_vm9, %v1419_v45, %v1224_v41 }
 0x220   :  { %1311 = vrot.lane.b32.xlu1 %v2646_v3, %s1837_s20  ;;  %1183 = vrot.lane.b32.xlu2 %v786_v36, %s1838_s21 }
 0x221   :  { %1247 = vrot.lane.b32.xlu0 %v2632_v44, %s1839_s22 }
 0x222   :  { %v1288_v47 = vpop.permute.xlu1 %1287  ;;  %v972_v58 = vpop.permute.xlu2 %971 }
 0x223   :  { %v1098_v46 = vpop.permute.xlu0 %1097  ;;  %v1453_v7 = vsel %vm1451_vm10, %v1436_v0, %v1288_v47 }
 0x224   :  { %1787 = vmatmul.msk.f32.gmra.mxu1 %vm1477_vm11, %v1453_v7 }
 0x228   :  { %1115 = vrot.lane.b32.xlu1 %v720_v63, %s1840_s23  ;;  %993 = vrot.lane.b32.xlu2 %v786_v36, %s1841_s24 }
 0x229   :  { %1057 = vrot.lane.b32.xlu0 %v2632_v44, %s1842_s25 }
 0x22a   :  { %v858_v10 = vpop.permute.xlu1 %857  ;;  %v1226_v48 = vpop.permute.xlu2 %1225 }
 0x22b   :  { %v868_v25 = vpop.permute.xlu0 %867  ;;  %v1343_v37 = vsel %vm617_vm2, %v2614_v24, %v858_v10 }
 0x22c   :  { %v1348_v62 = vsel %vm617_vm2, %v786_v36, %v868_v25  ;;  %v2824_v1 = vsel %vm1349_vm4, %v1343_v37, %v922_v38  ;;  %v819_v38 = vld [vmem:[#allocation2 + $0x122] sm:$0xff]  ;;  %v1369_v36 = vsel %vm1366_vm5, %v2734_v12, %v970_v33  ;;  %v1337_v25 = vsel %vm617_vm2, %v2672_v13, %v2793_v18 }
 0x22d   :  { %v1386_v45 = vsel %vm1383_vm6, %v1369_v36, %v2754_v22  ;;  %v1354_v12 = vsel %vm1349_vm4, %v1337_v25, %v910_v11  ;;  %v1336_v22 = vsel %vm617_vm2, %v2578_v15, %v2777_v56 }
 0x22e   :  { %v1403_v0 = vsel %vm1400_vm7, %v1386_v45, %v1098_v46  ;;  %v1371_v46 = vsel %vm1366_vm5, %v1354_v12, %v2567_v29 }
 0x22f   :  { %v1388_v11 = vsel %vm1383_vm6, %v1371_v46, %v2585_v50 }
 0x230   :  { %1121 = vrot.lane.b32.xlu1 %v2646_v3, %s1840_s23  ;;  %1185 = vrot.lane.b32.xlu2 %v787_v17, %s1838_s21  ;;  %v1405_v56 = vsel %vm1400_vm7, %v1388_v11, %v2565_v26 }
 0x231   :  { %1249 = vrot.lane.b32.xlu0 %v803_v42, %s1839_s22  ;;  %v1422_v50 = vsel %vm1417_vm8, %v1405_v56, %v2544_v2 }
 0x232   :  { %v932_v44 = vpop.permute.xlu1 %931  ;;  %v1100_v51 = vpop.permute.xlu2 %1099 }
 0x233   :  { %v1238_v49 = vpop.permute.xlu0 %1237  ;;  %v2831_v19 = vsel %vm1349_vm4, %v1348_v62, %v932_v44  ;;  %v1353_v62 = vsel %vm1349_vm4, %v1336_v22, %v2791_v20 }
 0x234   :  { %v1443_v24 = vsel %vm1434_vm9, %v1426_v53, %v1238_v49  ;;  %v1370_v13 = vsel %vm1366_vm5, %v1353_v62, %v972_v58 }
 0x238   :  { %1313 = vrot.lane.b32.xlu1 %v819_v38, %s1837_s20  ;;  %995 = vrot.lane.b32.xlu2 %v787_v17, %s1841_s24 }
 0x239   :  { %1059 = vrot.lane.b32.xlu0 %v803_v42, %s1842_s25 }
 0x23a   :  { %v1302_v3 = vpop.permute.xlu1 %1301  ;;  %v2842_v32 = vpop.permute.xlu2 %989 }
 0x23b   :  { %v1048_v16 = vpop.permute.xlu0 %1047  ;;  %v2838_v63 = vsel %vm1451_vm10, %v1443_v24, %v1302_v3 }
 0x23c   :  { %v1393_v53 = vsel %vm1383_vm6, %v2783_v9, %v1048_v16 }
 0x240   :  { %1123 = vrot.lane.b32.xlu1 %v819_v38, %s1840_s23  ;;  %1187 = vrot.lane.b32.xlu2 %v788_v14, %s1838_s21 }
 0x241   :  { %1251 = vrot.lane.b32.xlu0 %v804_v52, %s1839_s22 }
 0x242   :  { %v1112_v59 = vpop.permute.xlu1 %1111  ;;  %v2856_v10 = vpop.permute.xlu2 %1181 }
 0x243   :  { %v1290_v41 = vpop.permute.xlu0 %1289  ;;  %v2848_v28 = vsel %vm1400_vm7, %v1393_v53, %v1112_v59 }
 0x248   :  { %1315 = vrot.lane.b32.xlu1 %v820_v8, %s1837_s20 }
 0x24a   :  { %v1162_v47 = vpop.permute.xlu1 %1161  ;;  %v992_v44 = vpop.permute.xlu2 %991 }
 0x24b   :  { %v1054_v7 = vpop.permute.xlu0 %1053  ;;  %v1420_v9 = vsel %vm1417_vm8, %v1403_v0, %v1162_v47  ;;  %v1380_v58 = vsel %vm1366_vm5, %v2668_v61, %v992_v44 }
 0x24c   :  { %v1437_v37 = vsel %vm1434_vm9, %v1420_v9, %v1226_v48 }
 0x24d   :  { %v1454_v33 = vsel %vm1451_vm10, %v1437_v37, %v1290_v41 }
 0x24e   :  { %1788 = vmatmul.msk.f32.gmra.mxu1 %vm1477_vm11, %v1454_v33 }
 0x252   :  { %v1036_v18 = vpop.permute.xlu1 %1035 }
 0x253   :  { %v1246_v48 = vpop.permute.xlu0 %1245  ;;  %v1387_v42 = vsel %vm1383_vm6, %v1370_v13, %v1036_v18 }
 0x254   :  { %v1404_v17 = vsel %vm1400_vm7, %v1387_v42, %v1100_v51  ;;  %v860_v51 = vpop.permute.xlu2 %859 }
 0x255   :  { %v1421_v15 = vsel %vm1417_vm8, %v1404_v17, %v2575_v21 }
 0x256   :  { %v1438_v29 = vsel %vm1434_vm9, %v1421_v15, %v2554_v6  ;;  %v1439_v6 = vsel %vm1434_vm9, %v1422_v50, %v2605_v60  ;;  %v1425_v60 = vsel %vm1417_vm8, %v2708_v35, %v2522_v54 }
 0x257   :  { %v1455_v20 = vsel %vm1451_vm10, %v1438_v29, %v2532_v55  ;;  %v1456_v26 = vsel %vm1451_vm10, %v1439_v6, %v2583_v43  ;;  %v1442_v53 = vsel %vm1434_vm9, %v1425_v60, %v2540_v23 }
 0x258   :  { %1789 = vmatmul.msk.f32.gmra.mxu1 %vm1477_vm11, %v1455_v20 }
 0x25a   :  { %v1118_v49 = vpop.permute.xlu1 %1117 }
 0x25b   :  { %v1056_v24 = vpop.permute.xlu0 %1055 }
 0x25c   :  { %v1397_v21 = vsel %vm1383_vm6, %v1380_v58, %v1056_v24  ;;  %v1176_v2 = vpop.permute.xlu2 %1175 }
 0x25d   :  { %v1427_v45 = vsel %vm1417_vm8, %v2848_v28, %v1176_v2 }
 0x260   :  { %1790 = vmatmul.msk.f32.gmra.mxu1 %vm1477_vm11, %v1456_v26 }
 0x262   :  { %v1310_v55 = vpop.permute.xlu1 %1309 }
 0x263   :  { %v924_v38 = vpop.permute.xlu0 %923 }
 0x264   :  { %v986_v14 = vpop.permute.xlu2 %985 }
 0x265   :  { %v1377_v37 = vsel %vm1366_vm5, %v2824_v1, %v986_v14 }
 0x268   :  { %1791 = vmatmul.msk.f32.gmra.mxu1 %vm1477_vm11, %v2630_v30  ;;  %v1459_v30 = vsel %vm1451_vm10, %v1442_v53, %v2538_v31 }
 0x26a   :  { %v1120_v61 = vpop.permute.xlu1 %1119 }
 0x26b   :  { %v1240_v3 = vpop.permute.xlu0 %1239  ;;  %v1414_v16 = vsel %vm1400_vm7, %v1397_v21, %v1120_v61 }
 0x26c   :  { %v1178_v36 = vpop.permute.xlu2 %1177  ;;  %v1444_v47 = vsel %vm1434_vm9, %v1427_v45, %v1240_v3  ;;  %v1623_v45 = vld [vmem:[%s3004_s4] sm:$0xff] }
 0x270   :  { %1792 = vmatmul.msk.f32.gmra.mxu1 %vm1477_vm11, %v2690_v34 }
 0x272   :  { %v1304_v43 = vpop.permute.xlu1 %1303 }
 0x273   :  { %v1050_v52 = vpop.permute.xlu0 %1049  ;;  %v1461_v25 = vsel %vm1451_vm10, %v1444_v47, %v1304_v43 }
 0x274   :  { %v1543_v8 = vpop.f32.mrf.mxu1  ;;  %v1394_v28 = vsel %vm1383_vm6, %v1377_v37, %v1050_v52 }
 0x278   :  { %1793 = vmatmul.msk.f32.gmra.mxu1 %vm1477_vm11, %v1459_v30 }
 0x27a   :  { %v1114_v59 = vpop.permute.xlu1 %1113 }
 0x27b   :  { %v862_v41 = vpop.permute.xlu0 %861  ;;  %v1411_v12 = vsel %vm1400_vm7, %v1394_v28, %v1114_v59 }
 0x27c   :  { %v1345_v54 = vsel %vm617_vm2, %v2786_v27, %v862_v41  ;;  %v1428_v46 = vsel %vm1417_vm8, %v1411_v12, %v1178_v36 }
 0x27d   :  { %1591 = vxpose.xlu1.b32.start [1/16] (narrow) %v1543_v8, 16 }
 0x280   :  { %1794 = vmatmul.msk.f32.gmra.mxu1 %vm1477_vm11, %v2838_v63  ;;  %v988_v63 = vpop.permute.xlu2 %987 }
 0x282   :  { %v926_v34 = vpop.permute.xlu1 %925 }
 0x283   :  { %v1242_v35 = vpop.permute.xlu0 %1241  ;;  %v1362_v23 = vsel %vm1349_vm4, %v1345_v54, %v926_v34  ;;  %v1624_v34 = vld [vmem:[%s3004_s4 + $0x8] sm:$0xff] }
 0x284   :  { %v1379_v31 = vsel %vm1366_vm5, %v1362_v23, %v2842_v32  ;;  %v1445_v62 = vsel %vm1434_vm9, %v1428_v46, %v1242_v35  ;;  %v1843_v35 = vmov 0  }
 0x285   :  { %v1396_v0 = vsel %vm1383_vm6, %v1379_v31, %v1054_v7  ;;  %1828 = vset.pattern.permute.xlu0 %v1843_v35  ;;  %1827 = vset.pattern.permute.xlu2 %v1843_v35 }
 0x286   :  { %v1413_v9 = vsel %vm1400_vm7, %v1396_v0, %v1118_v49  ;;  %1632 = vperm.xlu0 %1828, %v1624_v34   ;;  %1627 = vperm.xlu2 %1827, %v1623_v45  }
 0x287   :  { %v1430_v27 = vsel %vm1417_vm8, %v1413_v9, %v2856_v10 }
 0x288   :  { %1795 = vmatmul.msk.f32.gmra.mxu1 %vm1477_vm11, %v1461_v25  ;;  %v1447_v32 = vsel %vm1434_vm9, %v1430_v27, %v1246_v48  ;;  %v1184_v1 = vpop.permute.xlu2 %1183  ;;  %v1344_v48 = vsel %vm617_vm2, %v2765_v4, %v860_v51 }
 0x289   :  { %v1464_v7 = vsel %vm1451_vm10, %v1447_v32, %v1310_v55  ;;  %v1361_v11 = vsel %vm1349_vm4, %v1344_v48, %v924_v38  ;;  %v1431_v6 = vsel %vm1417_vm8, %v1414_v16, %v1184_v1 }
 0x28a   :  { %v1306_v33 = vpop.permute.xlu1 %1305  ;;  %v1378_v42 = vsel %vm1366_vm5, %v1361_v11, %v988_v63 }
 0x28b   :  { %v1052_v22 = vpop.permute.xlu0 %1051  ;;  %v1462_v10 = vsel %vm1451_vm10, %v1445_v62, %v1306_v33 }
 0x28c   :  { %v1395_v17 = vsel %vm1383_vm6, %v1378_v42, %v1052_v22 }
 0x290   :  { %1796 = vmatmul.msk.f32.gmra.mxu1 %vm1477_vm11, %v1462_v10  ;;  %v994_v15 = vpop.permute.xlu2 %993 }
 0x292   :  { %v1312_v13 = vpop.permute.xlu1 %1311 }
 0x293   :  { %v1248_v18 = vpop.permute.xlu0 %1247 }
 0x298   :  { %v1186_v24 = vpop.permute.xlu2 %1185 }
 0x29a   :  { %v1116_v44 = vpop.permute.xlu1 %1115 }
 0x29b   :  { %v1412_v29 = vsel %vm1400_vm7, %v1395_v17, %v1116_v44  ;;  %v1058_v50 = vpop.permute.xlu0 %1057 }
 0x29c   :  { %v1429_v56 = vsel %vm1417_vm8, %v1412_v29, %v2680_v40  ;;  %v1448_v40 = vsel %vm1434_vm9, %v1431_v6, %v1248_v18 }
 0x29d   :  { %v1446_v20 = vsel %vm1434_vm9, %v1429_v56, %v2720_v5  ;;  %v1381_v5 = vsel %vm1366_vm5, %v2780_v39, %v994_v15 }
 0x29e   :  { %v1463_v4 = vsel %vm1451_vm10, %v1446_v20, %v2718_v57  ;;  %v1398_v26 = vsel %vm1383_vm6, %v1381_v5, %v1058_v50  ;;  %v1465_v57 = vsel %vm1451_vm10, %v1448_v40, %v1312_v13 }
 0x29f   :  { %1797 = vmatmul.msk.f32.gmra.mxu1 %vm1477_vm11, %v1463_v4 }
 0x2a0   :  { %v996_v55 = vpop.permute.xlu2 %995 }
 0x2a1   :  { %v1546_v58 = vpop.f32.mrf.mxu1  ;;  %v1382_v16 = vsel %vm1366_vm5, %v2831_v19, %v996_v55  ;;  %v1657_v55 = vld [vmem:[%s3005_s5] sm:$0xff] }
 0x2a2   :  { %v1122_v49 = vpop.permute.xlu1 %1121  ;;  %1592 = vxpose.xlu1.b32.cont [2/16] (narrow) %v1546_v58, 16 }
 0x2a3   :  { %v1250_v21 = vpop.permute.xlu0 %1249  ;;  %v1415_v38 = vsel %vm1400_vm7, %v1398_v26, %v1122_v49 }
 0x2a4   :  { %v1432_v2 = vsel %vm1417_vm8, %v1415_v38, %v1186_v24 }
 0x2a5   :  { %v1449_v60 = vsel %vm1434_vm9, %v1432_v2, %v1250_v21 }
 0x2a7   :  { %1798 = vmatmul.msk.f32.gmra.mxu1 %vm1477_vm11, %v1464_v7 }
 0x2a8   :  { %v1188_v14 = vpop.permute.xlu2 %1187 }
 0x2aa   :  { %v1314_v51 = vpop.permute.xlu1 %1313 }
 0x2ab   :  { %v1060_v61 = vpop.permute.xlu0 %1059  ;;  %v1466_v43 = vsel %vm1451_vm10, %v1449_v60, %v1314_v51 }
 0x2ac   :  { %v1399_v39 = vsel %vm1383_vm6, %v1382_v16, %v1060_v61 }
 0x2af   :  { %1799 = vmatmul.msk.f32.gmra.mxu1 %vm1477_vm11, %v1465_v57 }
 0x2b2   :  { %v1124_v3 = vpop.permute.xlu1 %1123 }
 0x2b3   :  { %v1416_v52 = vsel %vm1400_vm7, %v1399_v39, %v1124_v3  ;;  %v1252_v30 = vpop.permute.xlu0 %1251  ;;  %v1658_v39 = vld [vmem:[%s3005_s5 + $0x8] sm:$0xff] }
 0x2b4   :  { %v1433_v53 = vsel %vm1417_vm8, %v1416_v52, %v1188_v14 }
 0x2b5   :  { %v1450_v41 = vsel %vm1434_vm9, %v1433_v53, %v1252_v30  ;;  %v1684_v53 = vld [vmem:[%s3006_s6 + $0x8] sm:$0xff] }
 0x2b7   :  { %1800 = vmatmul.msk.f32.gmra.mxu1 %vm1477_vm11, %v1466_v43 }
 0x2ba   :  { %v1316_v59 = vpop.permute.xlu1 %1315 }
 0x2bb   :  { %v1467_v8 = vsel %vm1451_vm10, %v1450_v41, %v1316_v59 }
 0x2bf   :  { %1801 = vmatmul.msk.f32.gmra.mxu1 %vm1477_vm11, %v1467_v8  ;;  %v1683_v8 = vld [vmem:[%s3006_s6] sm:$0xff] }
 0x2cb   :  { %v1549_v19 = vpop.f32.mrf.mxu1 }
 0x2cc   :  { %1593 = vxpose.xlu1.b32.cont [3/16] (narrow) %v1549_v19, 16 }
 0x2d5   :  { %v1552_v36 = vpop.f32.mrf.mxu1 }
 0x2d6   :  { %1594 = vxpose.xlu1.b32.cont [4/16] (narrow) %v1552_v36, 16 }
 0x2dd   :  { %v1555_v54 = vpop.f32.mrf.mxu1 }
 0x2de   :  { %1595 = vxpose.xlu1.b32.cont [5/16] (narrow) %v1555_v54, 16 }
 0x2e0   :  { %v1628_v7 = vpop.permute.xlu2 %1627 }
 0x2e5   :  { %v1558_v23 = vpop.f32.mrf.mxu1 }
 0x2e6   :  { %1596 = vxpose.xlu1.b32.cont [6/16] (narrow) %v1558_v23, 16 }
 0x2ed   :  { %v1561_v31 = vpop.f32.mrf.mxu1 }
 0x2ee   :  { %1597 = vxpose.xlu1.b32.cont [7/16] (narrow) %v1561_v31, 16 }
 0x2f5   :  { %v1564_v0 = vpop.f32.mrf.mxu1 }
 0x2f6   :  { %1598 = vxpose.xlu1.b32.cont [8/16] (narrow) %v1564_v0, 16 }
 0x2f8   :  { %v1633_v22 = vpop.permute.xlu0 %1632 }
 0x2fd   :  { %v1567_v47 = vpop.f32.mrf.mxu1 }
 0x2fe   :  { %1599 = vxpose.xlu1.b32.cont [9/16] (narrow) %v1567_v47, 16 }
 0x305   :  { %v1570_v9 = vpop.f32.mrf.mxu1 }
 0x306   :  { %1600 = vxpose.xlu1.b32.cont [10/16] (narrow) %v1570_v9, 16 }
 0x30d   :  { %v1573_v63 = vpop.f32.mrf.mxu1 }
 0x30e   :  { %1601 = vxpose.xlu1.b32.cont [11/16] (narrow) %v1573_v63, 16 }
 0x31c   :  { %v1576_v25 = vpop.f32.mrf.mxu1 }
 0x31d   :  { %1602 = vxpose.xlu1.b32.cont [12/16] (narrow) %v1576_v25, 16 }
 0x324   :  { %v1579_v27 = vpop.f32.mrf.mxu1 }
 0x325   :  { %1603 = vxpose.xlu1.b32.cont [13/16] (narrow) %v1579_v27, 16 }
 0x32c   :  { %v1582_v37 = vpop.f32.mrf.mxu1 }
 0x32d   :  { %1604 = vxpose.xlu1.b32.cont [14/16] (narrow) %v1582_v37, 16 }
 0x334   :  { %v1585_v32 = vpop.f32.mrf.mxu1 }
 0x335   :  { %1605 = vxpose.xlu1.b32.cont [15/16] (narrow) %v1585_v32, 16 }
 0x33c   :  { %v1588_v28 = vpop.f32.mrf.mxu1 }
 0x33d   :  { %1606 = vxpose.xlu1.b32.end [16/16] (narrow) %v1588_v28, 16 }
 0x369   :  { %v1607_v12 = vpop.trf.xlu1 }
 0x36a   :  { %v2976_v33 = vadd.f32 %v1628_v7, %v1607_v12 }
 0x36c   :  { %1637 = vadd.xlane.f32.xlu2 %v2976_v33  ;;  %v1643_v62 = vmul.f32 %v2976_v33, %v2976_v33 }
 0x371   :  { %v1608_v46 = vpop.trf.xlu1 }
 0x372   :  { %v1636_v10 = vadd.f32 %v1633_v22, %v1608_v46 }
 0x374   :  { %1645 = vadd.xlane.f32.xlu2 %v1643_v62  ;;  %1639 = vadd.xlane.f32.xlu0 %v1636_v10  ;;  %v1644_v1 = vmul.f32 %v1636_v10, %v1636_v10 }
 0x37c   :  { %1647 = vadd.xlane.f32.xlu2 %v1644_v1 }
 0x3df   :  { %v1638_v13 = vpop.xlane.xlu2 %1637 }
 0x3e0   :  { %v1641_v18 = vmul.f32 0.0078125, %v1638_v13 }
 0x3e2   :  { %v1651_v42 = vmul.f32 %v1641_v18, %v1641_v18 }
 0x3e7   :  { %v1646_v48 = vpop.xlane.xlu2 %1645  ;;  %v1640_v11 = vpop.xlane.xlu0 %1639 }
 0x3e8   :  { %v1649_v17 = vmul.f32 0.0078125, %v1646_v48  ;;  %v1642_v15 = vmul.f32 0.0078125, %v1640_v11 }
 0x3ea   :  { %v1653_v44 = vsub.f32 %v1649_v17, %v1651_v42  ;;  %v1652_v20 = vmul.f32 %v1642_v15, %v1642_v15 }
 0x3ec   :  { %v1655_v29 = vmax.f32 %v1653_v44, 0.0 }
 0x3ee   :  { %v1659_v56 = vadd.f32 1e-05, %v1655_v29 }
 0x3ef   :  { %v1648_v50 = vpop.xlane.xlu2 %1647 }
 0x3f0   :  { %1830 = vrsqrt.f32 %v1659_v56  ;;  %v1650_v4 = vmul.f32 0.0078125, %v1648_v50  ;;  %vm1667_vm13 = vweird.f32 %v1659_v56 }
 0x3f2   :  { %v1654_v58 = vsub.f32 %v1650_v4, %v1652_v20 }
 0x3f4   :  { %v1656_v49 = vmax.f32 %v1654_v58, 0.0 }
 0x3f6   :  { %v1831_v24 = vpop.eup %1830  ;;  %v1660_v21 = vadd.f32 1e-05, %v1656_v49 }
 0x3f7   :  { %v1662_v6 = vmul.f32 %v1831_v24, %v1659_v56  ;;  %vm1668_vm12 = vweird.f32 %v1831_v24 }
 0x3f8   :  { %1832 = vrsqrt.f32 %v1660_v21  ;;  %vm1669_vm14 = vmor %vm1667_vm13, %vm1668_vm12  ;;  %vm1677_vm0 = vweird.f32 %v1660_v21 }
 0x3f9   :  { %v1663_v51 = vmul.f32 %v1831_v24, %v1662_v6 }
 0x3fb   :  { %v1664_v40 = vmul.f32 0.5, %v1663_v51 }
 0x3fd   :  { %v1665_v5 = vsub.f32 1.5, %v1664_v40 }
 0x3fe   :  { %v1833_v26 = vpop.eup %1832 }
 0x3ff   :  { %v1672_v57 = vmul.f32 %v1833_v26, %v1660_v21  ;;  %v1666_v38 = vmul.f32 %v1831_v24, %v1665_v5  ;;  %vm1678_vm15 = vweird.f32 %v1833_v26 }
 0x400   :  { %vm1679_vm1 = vmor %vm1677_vm0, %vm1678_vm15 }
 0x401   :  { %v1673_v2 = vmul.f32 %v1833_v26, %v1672_v57  ;;  %v1670_v61 = vsel %vm1669_vm14, %v1831_v24, %v1666_v38 }
 0x402   :  { %v1681_v3 = vmul.f32 %v1670_v61, %v1657_v55 }
 0x403   :  { %v1674_v16 = vmul.f32 0.5, %v1673_v2 }
 0x404   :  { %1691 = vperm.xlu2 %1827, %v1681_v3   ;;  %v1685_v41 = vmul.f32 %v1681_v3, %v1641_v18 }
 0x405   :  { %v1675_v60 = vsub.f32 1.5, %v1674_v16 }
 0x406   :  { %v1687_v19 = vsub.f32 %v1683_v8, %v1685_v41 }
 0x407   :  { %v1676_v43 = vmul.f32 %v1833_v26, %v1675_v60 }
 0x409   :  { %v1680_v52 = vsel %vm1679_vm1, %v1833_v26, %v1676_v43 }
 0x40a   :  { %v1682_v14 = vmul.f32 %v1680_v52, %v1658_v39 }
 0x40c   :  { %1696 = vperm.xlu0 %1828, %v1682_v14   ;;  %v1686_v30 = vmul.f32 %v1682_v14, %v1642_v15 }
 0x40e   :  { %v1688_v59 = vsub.f32 %v1684_v53, %v1686_v30 }
 0x410   :  { %1708 = vperm.xlu2 %1827, %v1688_v59  }
 0x414   :  { %1703 = vperm.xlu0 %1828, %v1687_v19  }
 0x45e   :  { %v1692_v36 = vpop.permute.xlu2 %1691 }
 0x45f   :  { %v1699_v45 = vmul.f32 %v1692_v36, %v2976_v33 }
 0x46a   :  { %v1709_v35 = vpop.permute.xlu2 %1708 }
 0x47e   :  { %v1697_v54 = vpop.permute.xlu0 %1696 }
 0x47f   :  { %v1700_v34 = vmul.f32 %v1697_v54, %v1636_v10 }
 0x481   :  { %v1712_v23 = vadd.f32 %v1709_v35, %v1700_v34 }
 0x483   :  { %v1714_v31 = vmax.f32 %v1712_v23, 0.0 }
 0x485   :  { %1716 = vst [vmem:[%s3007_s7 + $0x8] sm:$0xff] %v1714_v31 }
 0x486   :  { %v1704_v0 = vpop.permute.xlu0 %1703 }
 0x487   :  { %v1711_v47 = vadd.f32 %v1704_v0, %v1699_v45 }
 0x489   :  { %v1713_v9 = vmax.f32 %v1711_v47, 0.0 }
 0x48b   :  { %1715 = vst [vmem:[%s3007_s7] sm:$0xff] %v1713_v9 }

</bundles_post_ra>
